<compile_context>
chip_gen: v5e
topology: v5e:2x2
jax: 0.10.0
libtpu: 0.0.40
codegen_flags: <defaults>
</compile_context>

<pallas_src>
import math
import functools

import jax
import jax.numpy as jnp
from jax.experimental import pallas as pl
from jax.experimental.pallas import tpu as pltpu

_LANE = 128


def _round_up(x, m):
    return (x + m - 1) // m * m


def _encoder_stack_kernel(
        src_ref, pos_ref, kpos_ref, vin_ref,
        wq_ref, bq_ref, wk_ref, bk_ref, wv_ref, bv_ref, wo_ref, bo_ref,
        w1_ref, b1_ref, w2_ref, b2_ref,
        g1_ref, be1_ref, g2_ref, be2_ref,
        out_ref,
        *, d_real, num_heads, head_dim, seq_real, kv_tile, f_tile):
    """One (batch, query-tile, layer) grid step.

    The layer axis is innermost and "arbitrary", so the output block (this
    query tile's residual stream, f32) stays resident in VMEM across all
    layers and is written back to HBM once per (b, q-tile).  Feature axes are
    zero-padded lane-dense; pad lanes stay exactly zero because weights,
    biases and LayerNorm gamma/beta are zero-padded.
    """
    layer = pl.program_id(2)
    q_tile = src_ref.shape[1]
    d_pad = src_ref.shape[2]
    s_pad = kpos_ref.shape[1]
    cdt = jnp.bfloat16                       # MXU operand dtype
    scale = 1.0 / math.sqrt(head_dim)

    @pl.when(layer == 0)
    def _():
        out_ref[...] = src_ref[...]

    x = out_ref[0]                           # (q_tile, d_pad) f32 residual stream

    # lane mask over the real feature width (keeps pad lanes exactly zero and
    # makes the LayerNorm variance a proper centered two-pass computation).
    col = jax.lax.broadcasted_iota(jnp.int32, (1, d_pad), 1)
    ln_mask = (col < d_real).astype(jnp.float32)

    def layer_norm(y, gamma, beta):
        mu = jnp.sum(y, axis=-1, keepdims=True) * (1.0 / d_real)
        diff = (y - mu) * ln_mask
        var = jnp.sum(diff * diff, axis=-1, keepdims=True) * (1.0 / d_real)
        return diff * jax.lax.rsqrt(var + 1e-5) * gamma + beta

    def split_heads(t, rows):                # (rows, >=d_real) -> (H, rows, Dh) bf16
        t = t[:, :d_real].astype(cdt).reshape(rows, num_heads, head_dim)
        return jnp.transpose(t, (1, 0, 2))

    # ---- attention inputs: q = x + pos ; k = srcc + pos ; v = srcc ----------
    q_in = (x + pos_ref[0]).astype(cdt)
    q = jnp.dot(q_in, wq_ref[0], preferred_element_type=jnp.float32) + bq_ref[0]
    # K/V are projections of layer-constant inputs; recomputed per query tile.
    # TODO(synk): with many query tiles per batch, hoist K/V per layer into a
    #             scratch (needs layer-outer grid ordering + HBM residual carry).
    k = jnp.dot(kpos_ref[0], wk_ref[0], preferred_element_type=jnp.float32) + bk_ref[0]
    v = jnp.dot(vin_ref[0], wv_ref[0], preferred_element_type=jnp.float32) + bv_ref[0]

    qh = split_heads(q, q_tile)              # (H, q_tile, Dh)

    # ---- KV-tiled online softmax (flash) -------------------------------------
    m_i = jnp.full((num_heads, q_tile, 1), -1e30, jnp.float32)
    l_i = jnp.zeros((num_heads, q_tile, 1), jnp.float32)
    acc = jnp.zeros((num_heads, q_tile, head_dim), jnp.float32)
    for ti in range(s_pad // kv_tile):       # static, unrolled
        k0 = ti * kv_tile
        kh = split_heads(k[k0:k0 + kv_tile], kv_tile)
        vh = split_heads(v[k0:k0 + kv_tile], kv_tile)
        s = jnp.einsum('hqd,hkd->hqk', qh, kh,
                       preferred_element_type=jnp.float32) * scale
        if k0 + kv_tile > seq_real:          # only the last tile touches padding
            key_idx = k0 + jax.lax.broadcasted_iota(jnp.int32, (1, 1, kv_tile), 2)
            s = jnp.where(key_idx < seq_real, s, -1e30)
        m_new = jnp.maximum(m_i, jnp.max(s, axis=-1, keepdims=True))
        alpha = jnp.exp(m_i - m_new)
        p = jnp.exp(s - m_new)
        l_i = alpha * l_i + jnp.sum(p, axis=-1, keepdims=True)
        acc = alpha * acc + jnp.einsum('hqk,hkd->hqd', p.astype(cdt), vh,
                                       preferred_element_type=jnp.float32)
        m_i = m_new
    o = acc * pl.reciprocal(l_i, approx=True)            # (H, q_tile, Dh)

    attn = jnp.transpose(o, (1, 0, 2)).reshape(q_tile, d_real)
    wo = wo_ref[0][:d_real, :]                            # only real rows contribute
    attn = jnp.dot(attn.astype(cdt), wo,
                   preferred_element_type=jnp.float32) + bo_ref[0]

    # ---- residual + LayerNorm1 (dropout == identity at inference) ------------
    y = layer_norm(x + attn, g1_ref[0], be1_ref[0])

    # ---- feed-forward, tiled along dim_feedforward ----------------------------
    y_c = y.astype(cdt)
    f_pad = w1_ref.shape[2]
    ff = jnp.zeros((q_tile, d_pad), jnp.float32)
    for ti in range(f_pad // f_tile):        # static, unrolled
        f0 = ti * f_tile
        h = jnp.dot(y_c, w1_ref[0, :, f0:f0 + f_tile],
                    preferred_element_type=jnp.float32) + b1_ref[0, :, f0:f0 + f_tile]
        h = jnp.maximum(h, 0.0)              # ReLU
        ff = ff + jnp.dot(h.astype(cdt), w2_ref[0, f0:f0 + f_tile, :],
                          preferred_element_type=jnp.float32)
    ff = ff + b2_ref[0]

    # ---- residual + LayerNorm2, carry to next layer ---------------------------
    out_ref[0] = layer_norm(y + ff, g2_ref[0], be2_ref[0])


def _pad2d(a, rows, cols):
    return jnp.pad(a, ((0, rows - a.shape[0]), (0, cols - a.shape[1])))


def _pack_layer_stack(layers_params, d_pad, f_pad):
    """Stack per-layer params on a leading layer axis, zero-padded lane-dense.

    Weights bf16 (MXU operands); biases / LayerNorm params f32.  Pad columns
    of everything (incl. gamma/beta) are zero so pad lanes stay exactly zero.
    """
    def w(key, r, c):
        return jnp.stack([_pad2d(p[key], r, c).astype(jnp.bfloat16)
                          for p in layers_params])

    def vec(key, c):
        return jnp.stack([_pad2d(p[key], 1, c).astype(jnp.float32)
                          for p in layers_params])

    return dict(
        wq=w("wq", d_pad, d_pad), bq=vec("bq", d_pad),
        wk=w("wk", d_pad, d_pad), bk=vec("bk", d_pad),
        wv=w("wv", d_pad, d_pad), bv=vec("bv", d_pad),
        wo=w("wo", d_pad, d_pad), bo=vec("bo", d_pad),
        w1=w("w1", d_pad, f_pad), b1=vec("b1", f_pad),
        w2=w("w2", f_pad, d_pad), b2=vec("b2", d_pad),
        g1=vec("g1", d_pad), beta1=vec("beta1", d_pad),
        g2=vec("g2", d_pad), beta2=vec("beta2", d_pad),
    )


def _vmem_limit_bytes():
    # Size the scoped-VMEM limit per generation (~96 MiB v5e/v6e, ~48 MiB v7x).
    try:
        cap = pltpu.get_tpu_info().vmem_capacity_bytes
    except Exception:
        cap = 64 * 1024 * 1024
    return int(min(cap * 3 // 4, 100 * 1024 * 1024))


def transformer_encoder(src_sbd, srcc_sbd, pos_sbd, w, h, layers_params,
                        num_heads, mask=None, src_key_padding_mask=None,
                        final_norm=None):
    """Mirrors TransformerEncoder.forward(src, srcc, pos, w, h, ...).

    src/srcc/pos: (S, B, D) float tensors (PyTorch seq-first layout).
    """
    # TODO(synk): mask / src_key_padding_mask not implemented (None-only path).
    del mask, src_key_padding_mask
    del w, h  # carried by the PyTorch signature, unused by the layer math

    S, B, D = src_sbd.shape
    L = len(layers_params)
    Dff = layers_params[0]["w1"].shape[1]
    Dh = D // num_heads
    assert num_heads * Dh == D, "num_heads must divide d_model"

    D_pad = _round_up(D, _LANE)
    F_pad = _round_up(Dff, _LANE)

    # One tile size for queries and keys keeps S_pad simple; caps chosen to fit
    # comfortably inside the per-generation VMEM budget above.
    seq_t = min(256, _round_up(S, 8))
    S_pad = _round_up(S, seq_t)
    num_q_tiles = S_pad // seq_t
    f_tile = math.gcd(F_pad, 512)

    def to_bsd(a_sbd, dtype):            # (S, B, D) -> (B, S_pad, D_pad), zero-padded
        a = jnp.transpose(a_sbd, (1, 0, 2))
        a = jnp.pad(a, ((0, 0), (0, S_pad - S), (0, D_pad - D)))
        return a.astype(dtype)

    x0 = to_bsd(src_sbd, jnp.float32)                    # initial residual stream
    pos_b = to_bsd(pos_sbd, jnp.float32)                 # added to q each layer
    kpos_b = to_bsd(srcc_sbd + pos_sbd, jnp.bfloat16)    # k input, hoisted once
    vin_b = to_bsd(srcc_sbd, jnp.bfloat16)               # v input

    P = _pack_layer_stack(layers_params, D_pad, F_pad)

    qtile_spec = pl.BlockSpec((1, seq_t, D_pad), lambda b, q, l: (b, q, 0))
    seq_spec = pl.BlockSpec((1, S_pad, D_pad), lambda b, q, l: (b, 0, 0))

    def mat_spec(r, c):                  # per-layer weight, streamed by layer index
        return pl.BlockSpec((1, r, c), lambda b, q, l: (l, 0, 0))

    def vec_spec(c):                     # per-layer bias / LN param
        return pl.BlockSpec((1, 1, c), lambda b, q, l: (l, 0, 0))

    kernel = functools.partial(
        _encoder_stack_kernel,
        d_real=D, num_heads=num_heads, head_dim=Dh, seq_real=S,
        kv_tile=seq_t, f_tile=f_tile)

    out = pl.pallas_call(
        kernel,
        out_shape=jax.ShapeDtypeStruct((B, S_pad, D_pad), jnp.float32),
        grid=(B, num_q_tiles, L),
        in_specs=[
            qtile_spec, qtile_spec, seq_spec, seq_spec,   # src, pos, srcc+pos, srcc
            mat_spec(D_pad, D_pad), vec_spec(D_pad),      # Wq, bq
            mat_spec(D_pad, D_pad), vec_spec(D_pad),      # Wk, bk
            mat_spec(D_pad, D_pad), vec_spec(D_pad),      # Wv, bv
            mat_spec(D_pad, D_pad), vec_spec(D_pad),      # Wo, bo
            mat_spec(D_pad, F_pad), vec_spec(F_pad),      # W1, b1
            mat_spec(F_pad, D_pad), vec_spec(D_pad),      # W2, b2
            vec_spec(D_pad), vec_spec(D_pad),             # ln1 gamma, beta
            vec_spec(D_pad), vec_spec(D_pad),             # ln2 gamma, beta
        ],
        out_specs=qtile_spec,
        compiler_params=pltpu.CompilerParams(
            dimension_semantics=("parallel", "parallel", "arbitrary"),
            vmem_limit_bytes=_vmem_limit_bytes()),
    )(x0, pos_b, kpos_b, vin_b,
      P["wq"], P["bq"], P["wk"], P["bk"], P["wv"], P["bv"],
      P["wo"], P["bo"], P["w1"], P["b1"], P["w2"], P["b2"],
      P["g1"], P["beta1"], P["g2"], P["beta2"])

    x = out[:, :S, :D]                   # drop seq / lane padding -> (B, S, D)

    if final_norm is not None:           # TransformerEncoder.norm (None here)
        g, b = final_norm
        mu = jnp.mean(x, axis=-1, keepdims=True)
        var = jnp.mean((x - mu) ** 2, axis=-1, keepdims=True)
        x = (x - mu) * jax.lax.rsqrt(var + 1e-5) * g + b

    return jnp.transpose(x, (1, 0, 2))   # back to (S, B, D)


def init_layer_params(key, d_model, dim_feedforward):
    ks = jax.random.split(key, 6)
    s_d = 1.0 / math.sqrt(d_model)
    s_f = 1.0 / math.sqrt(dim_feedforward)
    f32 = jnp.float32
    return {
        "wq": jax.random.uniform(ks[0], (d_model, d_model), f32, -s_d, s_d),
        "bq": jnp.zeros((1, d_model), f32),
        "wk": jax.random.uniform(ks[1], (d_model, d_model), f32, -s_d, s_d),
        "bk": jnp.zeros((1, d_model), f32),
        "wv": jax.random.uniform(ks[2], (d_model, d_model), f32, -s_d, s_d),
        "bv": jnp.zeros((1, d_model), f32),
        "wo": jax.random.uniform(ks[3], (d_model, d_model), f32, -s_d, s_d),
        "bo": jnp.zeros((1, d_model), f32),
        "w1": jax.random.uniform(ks[4], (d_model, dim_feedforward), f32, -s_d, s_d),
        "b1": jnp.zeros((1, dim_feedforward), f32),
        "w2": jax.random.uniform(ks[5], (dim_feedforward, d_model), f32, -s_f, s_f),
        "b2": jnp.zeros((1, d_model), f32),
        "g1": jnp.ones((1, d_model), f32),
        "beta1": jnp.zeros((1, d_model), f32),
        "g2": jnp.ones((1, d_model), f32),
        "beta2": jnp.zeros((1, d_model), f32),
    }


def _reference_encoder(src, srcc, pos, layers_params, num_heads):
    """Pure-JAX f32 reference of the same forward pass (tolerance check)."""
    def ln(x, g, b):
        mu = jnp.mean(x, -1, keepdims=True)
        var = jnp.mean((x - mu) ** 2, -1, keepdims=True)
        return (x - mu) * jax.lax.rsqrt(var + 1e-5) * g + b

    S, B, D = src.shape
    Dh = D // num_heads
    x = src
    for p in layers_params:
        q = (x + pos) @ p["wq"] + p["bq"][0]
        k = (srcc + pos) @ p["wk"] + p["bk"][0]
        v = srcc @ p["wv"] + p["bv"][0]

        def heads(t):
            return jnp.transpose(t.reshape(S, B, num_heads, Dh), (1, 2, 0, 3))

        s = jnp.einsum('bhqd,bhkd->bhqk', heads(q), heads(k)) / math.sqrt(Dh)
        a = jax.nn.softmax(s, axis=-1)
        o = jnp.einsum('bhqk,bhkd->bhqd', a, heads(v))
        o = jnp.transpose(o, (2, 0, 1, 3)).reshape(S, B, D)
        attn = o @ p["wo"] + p["bo"][0]
        y = ln(x + attn, p["g1"][0], p["beta1"][0])
        ff = jnp.maximum(y @ p["w1"] + p["b1"][0], 0.0) @ p["w2"] + p["b2"][0]
        x = ln(y + ff, p["g2"][0], p["beta2"][0])
    return x


if __name__ == "__main__":
    # Small shapes: seq = w*h = 8 (w=4, h=2), batch = 2, d_model = 32,
    # nhead = 4, dim_feedforward = 64, num_layers = 2.
    S, B, D = 8, 2, 32
    NHEAD, DFF, NUM_LAYERS = 4, 64, 2
    w, h = 4, 2

    root = jax.random.PRNGKey(0)
    k_src, k_srcc, k_pos, k_params = jax.random.split(root, 4)

    src = jax.random.normal(k_src, (S, B, D), jnp.float32)
    srcc = jax.random.normal(k_srcc, (S, B, D), jnp.float32)
    pos = jax.random.normal(k_pos, (S, B, D), jnp.float32)

    layer_keys = jax.random.split(k_params, NUM_LAYERS)
    layers_params = [init_layer_params(k, D, DFF) for k in layer_keys]

    out = transformer_encoder(src, srcc, pos, w, h, layers_params, NHEAD)
    out = jax.block_until_ready(out)
    assert out.shape == (S, B, D) and out.dtype == jnp.float32
    assert bool(jnp.isfinite(out).all())

    # Tolerance check vs. pure-JAX f32 reference (bf16 MXU operands + approx
    # reciprocal make the kernel ~1e-3 relative off the f32 path).
    ref = _reference_encoder(src, srcc, pos, layers_params, NHEAD)
    assert bool(jnp.allclose(out, ref, atol=5e-2, rtol=5e-2))

    print("KERNEL_OK")
</pallas_src>

<mosaic_0001>
module attributes {stable_mosaic.version = 11 : i64} {
  func.func @_encoder_stack_kernel(%arg0: i32, %arg1: i32, %arg2: i32, %arg3: memref<1x8x128xf32, #tpu.memory_space<vmem>>, %arg4: memref<1x8x128xf32, #tpu.memory_space<vmem>>, %arg5: memref<1x8x128xbf16, #tpu.memory_space<vmem>>, %arg6: memref<1x8x128xbf16, #tpu.memory_space<vmem>>, %arg7: memref<1x128x128xbf16, #tpu.memory_space<vmem>>, %arg8: memref<1x1x128xf32, #tpu.memory_space<vmem>>, %arg9: memref<1x128x128xbf16, #tpu.memory_space<vmem>>, %arg10: memref<1x1x128xf32, #tpu.memory_space<vmem>>, %arg11: memref<1x128x128xbf16, #tpu.memory_space<vmem>>, %arg12: memref<1x1x128xf32, #tpu.memory_space<vmem>>, %arg13: memref<1x128x128xbf16, #tpu.memory_space<vmem>>, %arg14: memref<1x1x128xf32, #tpu.memory_space<vmem>>, %arg15: memref<1x128x128xbf16, #tpu.memory_space<vmem>>, %arg16: memref<1x1x128xf32, #tpu.memory_space<vmem>>, %arg17: memref<1x128x128xbf16, #tpu.memory_space<vmem>>, %arg18: memref<1x1x128xf32, #tpu.memory_space<vmem>>, %arg19: memref<1x1x128xf32, #tpu.memory_space<vmem>>, %arg20: memref<1x1x128xf32, #tpu.memory_space<vmem>>, %arg21: memref<1x1x128xf32, #tpu.memory_space<vmem>>, %arg22: memref<1x1x128xf32, #tpu.memory_space<vmem>>, %arg23: memref<1x8x128xf32, #tpu.memory_space<vmem>>) attributes {dimension_semantics = [#tpu.dimension_semantics<parallel>, #tpu.dimension_semantics<parallel>, #tpu.dimension_semantics<arbitrary>], iteration_bounds = array<i64: 2, 1, 2>, scalar_prefetch = 0 : i64, scratch_operands = 0 : i64, tpu.core_type = #tpu.core_type<tc>, window_params = [{transform_indices = @transform_0, window_bounds = array<i64: 1, 8, 128>}, {transform_indices = @transform_1, window_bounds = array<i64: 1, 8, 128>}, {transform_indices = @transform_2, window_bounds = array<i64: 1, 8, 128>}, {transform_indices = @transform_3, window_bounds = array<i64: 1, 8, 128>}, {transform_indices = @transform_4, window_bounds = array<i64: 1, 128, 128>}, {transform_indices = @transform_5, window_bounds = array<i64: 1, 1, 128>}, {transform_indices = @transform_6, window_bounds = array<i64: 1, 128, 128>}, {transform_indices = @transform_7, window_bounds = array<i64: 1, 1, 128>}, {transform_indices = @transform_8, window_bounds = array<i64: 1, 128, 128>}, {transform_indices = @transform_9, window_bounds = array<i64: 1, 1, 128>}, {transform_indices = @transform_10, window_bounds = array<i64: 1, 128, 128>}, {transform_indices = @transform_11, window_bounds = array<i64: 1, 1, 128>}, {transform_indices = @transform_12, window_bounds = array<i64: 1, 128, 128>}, {transform_indices = @transform_13, window_bounds = array<i64: 1, 1, 128>}, {transform_indices = @transform_14, window_bounds = array<i64: 1, 128, 128>}, {transform_indices = @transform_15, window_bounds = array<i64: 1, 1, 128>}, {transform_indices = @transform_16, window_bounds = array<i64: 1, 1, 128>}, {transform_indices = @transform_17, window_bounds = array<i64: 1, 1, 128>}, {transform_indices = @transform_18, window_bounds = array<i64: 1, 1, 128>}, {transform_indices = @transform_19, window_bounds = array<i64: 1, 1, 128>}, {transform_indices = @transform_20, window_bounds = array<i64: 1, 8, 128>}]} {
    %c0_i32 = arith.constant 0 : i32
    %0 = arith.cmpi eq, %arg2, %c0_i32 : i32
    %1 = arith.extui %0 : i1 to i32
    %c0_i32_0 = arith.constant 0 : i32
    %2 = arith.cmpi ne, %1, %c0_i32_0 : i32
    scf.if %2 {
      %c0_88 = arith.constant 0 : index
      %c0_89 = arith.constant 0 : index
      %c0_90 = arith.constant 0 : index
      %165 = vector.load %arg3[%c0_88, %c0_89, %c0_90] : memref<1x8x128xf32, #tpu.memory_space<vmem>>, vector<1x8x128xf32>
      %c0_91 = arith.constant 0 : index
      %c0_92 = arith.constant 0 : index
      %c0_93 = arith.constant 0 : index
      %166 = vector.load %arg23[%c0_91, %c0_92, %c0_93] : memref<1x8x128xf32, #tpu.memory_space<vmem>>, vector<1x8x128xf32>
      tpu.vector_store %arg23[%c0_91, %c0_92, %c0_93], %165 {strides = array<i32>} : memref<1x8x128xf32, #tpu.memory_space<vmem>>, vector<1x8x128xf32>,
    } else {
    }
    %c0 = arith.constant 0 : index
    %c0_1 = arith.constant 0 : index
    %c0_2 = arith.constant 0 : index
    %3 = vector.load %arg23[%c0, %c0_1, %c0_2] : memref<1x8x128xf32, #tpu.memory_space<vmem>>, vector<1x8x128xf32>
    %4 = vector.shape_cast %3 : vector<1x8x128xf32> to vector<8x128xf32>
    %5 = tpu.iota {dimensions = array<i32: 1>} : vector<1x128xi32>
    %c32_i32 = arith.constant 32 : i32
    %6 = vector.broadcast %c32_i32 : i32 to vector<1x128xi32>
    %7 = arith.cmpi slt, %5, %6 : vector<1x128xi32>
    %8 = arith.extui %7 : vector<1x128xi1> to vector<1x128xi32>
    %9 = arith.sitofp %8 : vector<1x128xi32> to vector<1x128xf32>
    %c0_3 = arith.constant 0 : index
    %c0_4 = arith.constant 0 : index
    %c0_5 = arith.constant 0 : index
    %10 = vector.load %arg4[%c0_3, %c0_4, %c0_5] : memref<1x8x128xf32, #tpu.memory_space<vmem>>, vector<1x8x128xf32>
    %11 = vector.shape_cast %10 : vector<1x8x128xf32> to vector<8x128xf32>
    %12 = arith.addf %4, %11 : vector<8x128xf32>
    %13 = arith.truncf %12 : vector<8x128xf32> to vector<8x128xbf16>
    %c0_6 = arith.constant 0 : index
    %c0_7 = arith.constant 0 : index
    %c0_8 = arith.constant 0 : index
    %14 = vector.load %arg7[%c0_6, %c0_7, %c0_8] : memref<1x128x128xbf16, #tpu.memory_space<vmem>>, vector<1x128x128xbf16>
    %15 = vector.shape_cast %14 : vector<1x128x128xbf16> to vector<128x128xbf16>
    %cst = arith.constant dense<0.000000e+00> : vector<8x128xf32>
    %16 = tpu.matmul %13, %15, %cst {dimension_numbers = #tpu.dot_dimension_numbers<[1], [0], [0], [1], [0, 0, 1, 1], [], []>} : vector<8x128xbf16>, vector<128x128xbf16>, vector<8x128xf32> -> vector<8x128xf32>
    %c0_9 = arith.constant 0 : index
    %c0_10 = arith.constant 0 : index
    %c0_11 = arith.constant 0 : index
    %17 = vector.load %arg8[%c0_9, %c0_10, %c0_11] : memref<1x1x128xf32, #tpu.memory_space<vmem>>, vector<1x1x128xf32>
    %18 = vector.shape_cast %17 : vector<1x1x128xf32> to vector<1x128xf32>
    %19 = vector.broadcast %18 : vector<1x128xf32> to vector<8x128xf32>
    %20 = arith.addf %16, %19 : vector<8x128xf32>
    %c0_12 = arith.constant 0 : index
    %c0_13 = arith.constant 0 : index
    %c0_14 = arith.constant 0 : index
    %21 = vector.load %arg5[%c0_12, %c0_13, %c0_14] : memref<1x8x128xbf16, #tpu.memory_space<vmem>>, vector<1x8x128xbf16>
    %22 = vector.shape_cast %21 : vector<1x8x128xbf16> to vector<8x128xbf16>
    %c0_15 = arith.constant 0 : index
    %c0_16 = arith.constant 0 : index
    %c0_17 = arith.constant 0 : index
    %23 = vector.load %arg9[%c0_15, %c0_16, %c0_17] : memref<1x128x128xbf16, #tpu.memory_space<vmem>>, vector<1x128x128xbf16>
    %24 = vector.shape_cast %23 : vector<1x128x128xbf16> to vector<128x128xbf16>
    %cst_18 = arith.constant dense<0.000000e+00> : vector<8x128xf32>
    %25 = tpu.matmul %22, %24, %cst_18 {dimension_numbers = #tpu.dot_dimension_numbers<[1], [0], [0], [1], [0, 0, 1, 1], [], []>} : vector<8x128xbf16>, vector<128x128xbf16>, vector<8x128xf32> -> vector<8x128xf32>
    %c0_19 = arith.constant 0 : index
    %c0_20 = arith.constant 0 : index
    %c0_21 = arith.constant 0 : index
    %26 = vector.load %arg10[%c0_19, %c0_20, %c0_21] : memref<1x1x128xf32, #tpu.memory_space<vmem>>, vector<1x1x128xf32>
    %27 = vector.shape_cast %26 : vector<1x1x128xf32> to vector<1x128xf32>
    %28 = vector.broadcast %27 : vector<1x128xf32> to vector<8x128xf32>
    %29 = arith.addf %25, %28 : vector<8x128xf32>
    %c0_22 = arith.constant 0 : index
    %c0_23 = arith.constant 0 : index
    %c0_24 = arith.constant 0 : index
    %30 = vector.load %arg6[%c0_22, %c0_23, %c0_24] : memref<1x8x128xbf16, #tpu.memory_space<vmem>>, vector<1x8x128xbf16>
    %31 = vector.shape_cast %30 : vector<1x8x128xbf16> to vector<8x128xbf16>
    %c0_25 = arith.constant 0 : index
    %c0_26 = arith.constant 0 : index
    %c0_27 = arith.constant 0 : index
    %32 = vector.load %arg11[%c0_25, %c0_26, %c0_27] : memref<1x128x128xbf16, #tpu.memory_space<vmem>>, vector<1x128x128xbf16>
    %33 = vector.shape_cast %32 : vector<1x128x128xbf16> to vector<128x128xbf16>
    %cst_28 = arith.constant dense<0.000000e+00> : vector<8x128xf32>
    %34 = tpu.matmul %31, %33, %cst_28 {dimension_numbers = #tpu.dot_dimension_numbers<[1], [0], [0], [1], [0, 0, 1, 1], [], []>} : vector<8x128xbf16>, vector<128x128xbf16>, vector<8x128xf32> -> vector<8x128xf32>
    %c0_29 = arith.constant 0 : index
    %c0_30 = arith.constant 0 : index
    %c0_31 = arith.constant 0 : index
    %35 = vector.load %arg12[%c0_29, %c0_30, %c0_31] : memref<1x1x128xf32, #tpu.memory_space<vmem>>, vector<1x1x128xf32>
    %36 = vector.shape_cast %35 : vector<1x1x128xf32> to vector<1x128xf32>
    %37 = vector.broadcast %36 : vector<1x128xf32> to vector<8x128xf32>
    %38 = arith.addf %34, %37 : vector<8x128xf32>
    %39 = vector.extract_strided_slice %20 {offsets = [0, 0], sizes = [8, 32], strides = [1, 1]} : vector<8x128xf32> to vector<8x32xf32>
    %40 = arith.truncf %39 : vector<8x32xf32> to vector<8x32xbf16>
    %41 = vector.shape_cast %40 : vector<8x32xbf16> to vector<8x4x8xbf16>
    %42 = tpu.transpose %41, [1, 0, 2] : vector<8x4x8xbf16> -> vector<4x8x8xbf16>
    %cst_32 = arith.constant -1.000000e+30 : f32
    %43 = vector.broadcast %cst_32 : f32 to vector<4x8x1xf32>
    %cst_33 = arith.constant 0.000000e+00 : f32
    %44 = vector.broadcast %cst_33 : f32 to vector<4x8x1xf32>
    %cst_34 = arith.constant 0.000000e+00 : f32
    %45 = vector.broadcast %cst_34 : f32 to vector<4x8x8xf32>
    %46 = vector.extract_strided_slice %29 {offsets = [0, 0], sizes = [8, 32], strides = [1, 1]} : vector<8x128xf32> to vector<8x32xf32>
    %47 = arith.truncf %46 : vector<8x32xf32> to vector<8x32xbf16>
    %48 = vector.shape_cast %47 : vector<8x32xbf16> to vector<8x4x8xbf16>
    %49 = tpu.transpose %48, [1, 0, 2] : vector<8x4x8xbf16> -> vector<4x8x8xbf16>
    %50 = vector.extract_strided_slice %38 {offsets = [0, 0], sizes = [8, 32], strides = [1, 1]} : vector<8x128xf32> to vector<8x32xf32>
    %51 = arith.truncf %50 : vector<8x32xf32> to vector<8x32xbf16>
    %52 = vector.shape_cast %51 : vector<8x32xbf16> to vector<8x4x8xbf16>
    %53 = tpu.transpose %52, [1, 0, 2] : vector<8x4x8xbf16> -> vector<4x8x8xbf16>
    "tpu.trace_start"() <{level = 10 : i32, message = "hqd,hkd->hqk"}> : () -> ()
    %cst_35 = arith.constant dense<0.000000e+00> : vector<4x8x8xf32>
    %54 = tpu.matmul %42, %49, %cst_35 {dimension_numbers = #tpu.dot_dimension_numbers<[2], [2], [1], [1], [0, 0, 0, 1, 1, 1], [0], [0]>} : vector<4x8x8xbf16>, vector<4x8x8xbf16>, vector<4x8x8xf32> -> vector<4x8x8xf32>
    "tpu.trace_stop"() : () -> ()
    %cst_36 = arith.constant 0.353553385 : f32
    %55 = vector.broadcast %cst_36 : f32 to vector<4x8x8xf32>
    %56 = arith.mulf %54, %55 : vector<4x8x8xf32>
    %cst_37 = arith.constant dense<0xFF800000> : vector<4x8xf32>
    %57 = vector.multi_reduction <maximumf>, %56, %cst_37 [2] : vector<4x8x8xf32> to vector<4x8xf32>
    %58 = vector.shape_cast %57 : vector<4x8xf32> to vector<4x8x1xf32>
    %59 = arith.maximumf %43, %58 : vector<4x8x1xf32>
    %60 = arith.subf %43, %59 : vector<4x8x1xf32>
    %61 = math.exp %60 : vector<4x8x1xf32>
    %62 = vector.broadcast %59 : vector<4x8x1xf32> to vector<4x8x8xf32>
    %63 = arith.subf %56, %62 : vector<4x8x8xf32>
    %64 = math.exp %63 : vector<4x8x8xf32>
    %65 = arith.mulf %61, %44 : vector<4x8x1xf32>
    %cst_38 = arith.constant dense<0.000000e+00> : vector<4x8xf32>
    %66 = vector.multi_reduction <add>, %64, %cst_38 [2] : vector<4x8x8xf32> to vector<4x8xf32>
    %67 = vector.shape_cast %66 : vector<4x8xf32> to vector<4x8x1xf32>
    %68 = arith.addf %65, %67 : vector<4x8x1xf32>
    %69 = vector.broadcast %61 : vector<4x8x1xf32> to vector<4x8x8xf32>
    %70 = arith.mulf %69, %45 : vector<4x8x8xf32>
    %71 = arith.truncf %64 : vector<4x8x8xf32> to vector<4x8x8xbf16>
    "tpu.trace_start"() <{level = 10 : i32, message = "hqk,hkd->hqd"}> : () -> ()
    %cst_39 = arith.constant dense<0.000000e+00> : vector<4x8x8xf32>
    %72 = tpu.matmul %71, %53, %cst_39 {dimension_numbers = #tpu.dot_dimension_numbers<[2], [1], [1], [2], [0, 0, 0, 1, 1, 2], [0], [0]>} : vector<4x8x8xbf16>, vector<4x8x8xbf16>, vector<4x8x8xf32> -> vector<4x8x8xf32>
    "tpu.trace_stop"() : () -> ()
    %73 = arith.addf %70, %72 : vector<4x8x8xf32>
    %74 = tpu.reciprocal %68 {approx = true} : vector<4x8x1xf32> -> vector<4x8x1xf32>
    %75 = vector.broadcast %74 : vector<4x8x1xf32> to vector<4x8x8xf32>
    %76 = arith.mulf %73, %75 : vector<4x8x8xf32>
    %77 = tpu.transpose %76, [1, 0, 2] : vector<4x8x8xf32> -> vector<8x4x8xf32>
    %78 = vector.shape_cast %77 : vector<8x4x8xf32> to vector<8x32xf32>
    %c0_40 = arith.constant 0 : index
    %c0_41 = arith.constant 0 : index
    %c0_42 = arith.constant 0 : index
    %79 = vector.load %arg13[%c0_40, %c0_41, %c0_42] : memref<1x128x128xbf16, #tpu.memory_space<vmem>>, vector<1x128x128xbf16>
    %80 = vector.shape_cast %79 : vector<1x128x128xbf16> to vector<128x128xbf16>
    %81 = vector.extract_strided_slice %80 {offsets = [0, 0], sizes = [32, 128], strides = [1, 1]} : vector<128x128xbf16> to vector<32x128xbf16>
    %82 = arith.truncf %78 : vector<8x32xf32> to vector<8x32xbf16>
    %cst_43 = arith.constant dense<0.000000e+00> : vector<8x128xf32>
    %83 = tpu.matmul %82, %81, %cst_43 {dimension_numbers = #tpu.dot_dimension_numbers<[1], [0], [0], [1], [0, 0, 1, 1], [], []>} : vector<8x32xbf16>, vector<32x128xbf16>, vector<8x128xf32> -> vector<8x128xf32>
    %c0_44 = arith.constant 0 : index
    %c0_45 = arith.constant 0 : index
    %c0_46 = arith.constant 0 : index
    %84 = vector.load %arg14[%c0_44, %c0_45, %c0_46] : memref<1x1x128xf32, #tpu.memory_space<vmem>>, vector<1x1x128xf32>
    %85 = vector.shape_cast %84 : vector<1x1x128xf32> to vector<1x128xf32>
    %86 = vector.broadcast %85 : vector<1x128xf32> to vector<8x128xf32>
    %87 = arith.addf %83, %86 : vector<8x128xf32>
    %88 = arith.addf %4, %87 : vector<8x128xf32>
    %c0_47 = arith.constant 0 : index
    %c0_48 = arith.constant 0 : index
    %c0_49 = arith.constant 0 : index
    %89 = vector.load %arg19[%c0_47, %c0_48, %c0_49] : memref<1x1x128xf32, #tpu.memory_space<vmem>>, vector<1x1x128xf32>
    %90 = vector.shape_cast %89 : vector<1x1x128xf32> to vector<1x128xf32>
    %c0_50 = arith.constant 0 : index
    %c0_51 = arith.constant 0 : index
    %c0_52 = arith.constant 0 : index
    %91 = vector.load %arg20[%c0_50, %c0_51, %c0_52] : memref<1x1x128xf32, #tpu.memory_space<vmem>>, vector<1x1x128xf32>
    %92 = vector.shape_cast %91 : vector<1x1x128xf32> to vector<1x128xf32>
    %cst_53 = arith.constant dense<0.000000e+00> : vector<8xf32>
    %93 = vector.multi_reduction <add>, %88, %cst_53 [1] : vector<8x128xf32> to vector<8xf32>
    %94 = vector.shape_cast %93 : vector<8xf32> to vector<8x1xf32>
    %cst_54 = arith.constant 3.125000e-02 : f32
    %95 = vector.broadcast %cst_54 : f32 to vector<8x1xf32>
    %96 = arith.mulf %94, %95 : vector<8x1xf32>
    %97 = vector.broadcast %96 : vector<8x1xf32> to vector<8x128xf32>
    %98 = arith.subf %88, %97 : vector<8x128xf32>
    %99 = vector.broadcast %9 : vector<1x128xf32> to vector<8x128xf32>
    %100 = arith.mulf %98, %99 : vector<8x128xf32>
    %101 = arith.mulf %100, %100 : vector<8x128xf32>
    %cst_55 = arith.constant dense<0.000000e+00> : vector<8xf32>
    %102 = vector.multi_reduction <add>, %101, %cst_55 [1] : vector<8x128xf32> to vector<8xf32>
    %103 = vector.shape_cast %102 : vector<8xf32> to vector<8x1xf32>
    %cst_56 = arith.constant 3.125000e-02 : f32
    %104 = vector.broadcast %cst_56 : f32 to vector<8x1xf32>
    %105 = arith.mulf %103, %104 : vector<8x1xf32>
    %cst_57 = arith.constant 9.99999974E-6 : f32
    %106 = vector.broadcast %cst_57 : f32 to vector<8x1xf32>
    %107 = arith.addf %105, %106 : vector<8x1xf32>
    %108 = math.rsqrt %107 : vector<8x1xf32>
    %109 = vector.broadcast %108 : vector<8x1xf32> to vector<8x128xf32>
    %110 = arith.mulf %100, %109 : vector<8x128xf32>
    %111 = vector.broadcast %90 : vector<1x128xf32> to vector<8x128xf32>
    %112 = arith.mulf %110, %111 : vector<8x128xf32>
    %113 = vector.broadcast %92 : vector<1x128xf32> to vector<8x128xf32>
    %114 = arith.addf %112, %113 : vector<8x128xf32>
    %115 = arith.truncf %114 : vector<8x128xf32> to vector<8x128xbf16>
    %cst_58 = arith.constant 0.000000e+00 : f32
    %116 = vector.broadcast %cst_58 : f32 to vector<8x128xf32>
    %c0_59 = arith.constant 0 : index
    %c0_60 = arith.constant 0 : index
    %c0_61 = arith.constant 0 : index
    %117 = vector.load %arg15[%c0_59, %c0_60, %c0_61] : memref<1x128x128xbf16, #tpu.memory_space<vmem>>, vector<1x128x128xbf16>
    %118 = vector.shape_cast %117 : vector<1x128x128xbf16> to vector<128x128xbf16>
    %cst_62 = arith.constant dense<0.000000e+00> : vector<8x128xf32>
    %119 = tpu.matmul %115, %118, %cst_62 {dimension_numbers = #tpu.dot_dimension_numbers<[1], [0], [0], [1], [0, 0, 1, 1], [], []>} : vector<8x128xbf16>, vector<128x128xbf16>, vector<8x128xf32> -> vector<8x128xf32>
    %c0_63 = arith.constant 0 : index
    %c0_64 = arith.constant 0 : index
    %c0_65 = arith.constant 0 : index
    %120 = vector.load %arg16[%c0_63, %c0_64, %c0_65] : memref<1x1x128xf32, #tpu.memory_space<vmem>>, vector<1x1x128xf32>
    %121 = vector.shape_cast %120 : vector<1x1x128xf32> to vector<1x128xf32>
    %122 = vector.broadcast %121 : vector<1x128xf32> to vector<8x128xf32>
    %123 = arith.addf %119, %122 : vector<8x128xf32>
    %cst_66 = arith.constant 0.000000e+00 : f32
    %124 = vector.broadcast %cst_66 : f32 to vector<8x128xf32>
    %125 = arith.maximumf %123, %124 : vector<8x128xf32>
    %126 = arith.truncf %125 : vector<8x128xf32> to vector<8x128xbf16>
    %c0_67 = arith.constant 0 : index
    %c0_68 = arith.constant 0 : index
    %c0_69 = arith.constant 0 : index
    %127 = vector.load %arg17[%c0_67, %c0_68, %c0_69] : memref<1x128x128xbf16, #tpu.memory_space<vmem>>, vector<1x128x128xbf16>
    %128 = vector.shape_cast %127 : vector<1x128x128xbf16> to vector<128x128xbf16>
    %cst_70 = arith.constant dense<0.000000e+00> : vector<8x128xf32>
    %129 = tpu.matmul %126, %128, %cst_70 {dimension_numbers = #tpu.dot_dimension_numbers<[1], [0], [0], [1], [0, 0, 1, 1], [], []>} : vector<8x128xbf16>, vector<128x128xbf16>, vector<8x128xf32> -> vector<8x128xf32>
    %130 = arith.addf %116, %129 : vector<8x128xf32>
    %c0_71 = arith.constant 0 : index
    %c0_72 = arith.constant 0 : index
    %c0_73 = arith.constant 0 : index
    %131 = vector.load %arg18[%c0_71, %c0_72, %c0_73] : memref<1x1x128xf32, #tpu.memory_space<vmem>>, vector<1x1x128xf32>
    %132 = vector.shape_cast %131 : vector<1x1x128xf32> to vector<1x128xf32>
    %133 = vector.broadcast %132 : vector<1x128xf32> to vector<8x128xf32>
    %134 = arith.addf %130, %133 : vector<8x128xf32>
    %135 = arith.addf %114, %134 : vector<8x128xf32>
    %c0_74 = arith.constant 0 : index
    %c0_75 = arith.constant 0 : index
    %c0_76 = arith.constant 0 : index
    %136 = vector.load %arg21[%c0_74, %c0_75, %c0_76] : memref<1x1x128xf32, #tpu.memory_space<vmem>>, vector<1x1x128xf32>
    %137 = vector.shape_cast %136 : vector<1x1x128xf32> to vector<1x128xf32>
    %c0_77 = arith.constant 0 : index
    %c0_78 = arith.constant 0 : index
    %c0_79 = arith.constant 0 : index
    %138 = vector.load %arg22[%c0_77, %c0_78, %c0_79] : memref<1x1x128xf32, #tpu.memory_space<vmem>>, vector<1x1x128xf32>
    %139 = vector.shape_cast %138 : vector<1x1x128xf32> to vector<1x128xf32>
    %cst_80 = arith.constant dense<0.000000e+00> : vector<8xf32>
    %140 = vector.multi_reduction <add>, %135, %cst_80 [1] : vector<8x128xf32> to vector<8xf32>
    %141 = vector.shape_cast %140 : vector<8xf32> to vector<8x1xf32>
    %cst_81 = arith.constant 3.125000e-02 : f32
    %142 = vector.broadcast %cst_81 : f32 to vector<8x1xf32>
    %143 = arith.mulf %141, %142 : vector<8x1xf32>
    %144 = vector.broadcast %143 : vector<8x1xf32> to vector<8x128xf32>
    %145 = arith.subf %135, %144 : vector<8x128xf32>
    %146 = vector.broadcast %9 : vector<1x128xf32> to vector<8x128xf32>
    %147 = arith.mulf %145, %146 : vector<8x128xf32>
    %148 = arith.mulf %147, %147 : vector<8x128xf32>
    %cst_82 = arith.constant dense<0.000000e+00> : vector<8xf32>
    %149 = vector.multi_reduction <add>, %148, %cst_82 [1] : vector<8x128xf32> to vector<8xf32>
    %150 = vector.shape_cast %149 : vector<8xf32> to vector<8x1xf32>
    %cst_83 = arith.constant 3.125000e-02 : f32
    %151 = vector.broadcast %cst_83 : f32 to vector<8x1xf32>
    %152 = arith.mulf %150, %151 : vector<8x1xf32>
    %cst_84 = arith.constant 9.99999974E-6 : f32
    %153 = vector.broadcast %cst_84 : f32 to vector<8x1xf32>
    %154 = arith.addf %152, %153 : vector<8x1xf32>
    %155 = math.rsqrt %154 : vector<8x1xf32>
    %156 = vector.broadcast %155 : vector<8x1xf32> to vector<8x128xf32>
    %157 = arith.mulf %147, %156 : vector<8x128xf32>
    %158 = vector.broadcast %137 : vector<1x128xf32> to vector<8x128xf32>
    %159 = arith.mulf %157, %158 : vector<8x128xf32>
    %160 = vector.broadcast %139 : vector<1x128xf32> to vector<8x128xf32>
    %161 = arith.addf %159, %160 : vector<8x128xf32>
    %c0_85 = arith.constant 0 : index
    %c0_86 = arith.constant 0 : index
    %c0_87 = arith.constant 0 : index
    %162 = vector.load %arg23[%c0_85, %c0_86, %c0_87] : memref<1x8x128xf32, #tpu.memory_space<vmem>>, vector<1x8x128xf32>
    %163 = vector.shape_cast %162 : vector<1x8x128xf32> to vector<8x128xf32>
    %164 = vector.shape_cast %161 : vector<8x128xf32> to vector<1x8x128xf32>
    tpu.vector_store %arg23[%c0_85, %c0_86, %c0_87], %164 {strides = array<i32>} : memref<1x8x128xf32, #tpu.memory_space<vmem>>, vector<1x8x128xf32>,
    return
  }
  func.func @transform_0(%arg0: i32, %arg1: i32, %arg2: i32) -> (i32, i32, i32) {
    %c0_i32 = arith.constant 0 : i32
    %c0_i32_0 = arith.constant 0 : i32
    return %arg0, %arg1, %c0_i32 : i32, i32, i32
  }
  func.func @transform_1(%arg0: i32, %arg1: i32, %arg2: i32) -> (i32, i32, i32) {
    %c0_i32 = arith.constant 0 : i32
    %c0_i32_0 = arith.constant 0 : i32
    return %arg0, %arg1, %c0_i32 : i32, i32, i32
  }
  func.func @transform_2(%arg0: i32, %arg1: i32, %arg2: i32) -> (i32, i32, i32) {
    %c0_i32 = arith.constant 0 : i32
    %c0_i32_0 = arith.constant 0 : i32
    %c0_i32_1 = arith.constant 0 : i32
    return %arg0, %c0_i32, %c0_i32_0 : i32, i32, i32
  }
  func.func @transform_3(%arg0: i32, %arg1: i32, %arg2: i32) -> (i32, i32, i32) {
    %c0_i32 = arith.constant 0 : i32
    %c0_i32_0 = arith.constant 0 : i32
    %c0_i32_1 = arith.constant 0 : i32
    return %arg0, %c0_i32, %c0_i32_0 : i32, i32, i32
  }
  func.func @transform_4(%arg0: i32, %arg1: i32, %arg2: i32) -> (i32, i32, i32) {
    %c0_i32 = arith.constant 0 : i32
    %c0_i32_0 = arith.constant 0 : i32
    %c0_i32_1 = arith.constant 0 : i32
    return %arg2, %c0_i32, %c0_i32_0 : i32, i32, i32
  }
  func.func @transform_5(%arg0: i32, %arg1: i32, %arg2: i32) -> (i32, i32, i32) {
    %c0_i32 = arith.constant 0 : i32
    %c0_i32_0 = arith.constant 0 : i32
    %c0_i32_1 = arith.constant 0 : i32
    return %arg2, %c0_i32, %c0_i32_0 : i32, i32, i32
  }
  func.func @transform_6(%arg0: i32, %arg1: i32, %arg2: i32) -> (i32, i32, i32) {
    %c0_i32 = arith.constant 0 : i32
    %c0_i32_0 = arith.constant 0 : i32
    %c0_i32_1 = arith.constant 0 : i32
    return %arg2, %c0_i32, %c0_i32_0 : i32, i32, i32
  }
  func.func @transform_7(%arg0: i32, %arg1: i32, %arg2: i32) -> (i32, i32, i32) {
    %c0_i32 = arith.constant 0 : i32
    %c0_i32_0 = arith.constant 0 : i32
    %c0_i32_1 = arith.constant 0 : i32
    return %arg2, %c0_i32, %c0_i32_0 : i32, i32, i32
  }
  func.func @transform_8(%arg0: i32, %arg1: i32, %arg2: i32) -> (i32, i32, i32) {
    %c0_i32 = arith.constant 0 : i32
    %c0_i32_0 = arith.constant 0 : i32
    %c0_i32_1 = arith.constant 0 : i32
    return %arg2, %c0_i32, %c0_i32_0 : i32, i32, i32
  }
  func.func @transform_9(%arg0: i32, %arg1: i32, %arg2: i32) -> (i32, i32, i32) {
    %c0_i32 = arith.constant 0 : i32
    %c0_i32_0 = arith.constant 0 : i32
    %c0_i32_1 = arith.constant 0 : i32
    return %arg2, %c0_i32, %c0_i32_0 : i32, i32, i32
  }
  func.func @transform_10(%arg0: i32, %arg1: i32, %arg2: i32) -> (i32, i32, i32) {
    %c0_i32 = arith.constant 0 : i32
    %c0_i32_0 = arith.constant 0 : i32
    %c0_i32_1 = arith.constant 0 : i32
    return %arg2, %c0_i32, %c0_i32_0 : i32, i32, i32
  }
  func.func @transform_11(%arg0: i32, %arg1: i32, %arg2: i32) -> (i32, i32, i32) {
    %c0_i32 = arith.constant 0 : i32
    %c0_i32_0 = arith.constant 0 : i32
    %c0_i32_1 = arith.constant 0 : i32
    return %arg2, %c0_i32, %c0_i32_0 : i32, i32, i32
  }
  func.func @transform_12(%arg0: i32, %arg1: i32, %arg2: i32) -> (i32, i32, i32) {
    %c0_i32 = arith.constant 0 : i32
    %c0_i32_0 = arith.constant 0 : i32
    %c0_i32_1 = arith.constant 0 : i32
    return %arg2, %c0_i32, %c0_i32_0 : i32, i32, i32
  }
  func.func @transform_13(%arg0: i32, %arg1: i32, %arg2: i32) -> (i32, i32, i32) {
    %c0_i32 = arith.constant 0 : i32
    %c0_i32_0 = arith.constant 0 : i32
    %c0_i32_1 = arith.constant 0 : i32
    return %arg2, %c0_i32, %c0_i32_0 : i32, i32, i32
  }
  func.func @transform_14(%arg0: i32, %arg1: i32, %arg2: i32) -> (i32, i32, i32) {
    %c0_i32 = arith.constant 0 : i32
    %c0_i32_0 = arith.constant 0 : i32
    %c0_i32_1 = arith.constant 0 : i32
    return %arg2, %c0_i32, %c0_i32_0 : i32, i32, i32
  }
  func.func @transform_15(%arg0: i32, %arg1: i32, %arg2: i32) -> (i32, i32, i32) {
    %c0_i32 = arith.constant 0 : i32
    %c0_i32_0 = arith.constant 0 : i32
    %c0_i32_1 = arith.constant 0 : i32
    return %arg2, %c0_i32, %c0_i32_0 : i32, i32, i32
  }
  func.func @transform_16(%arg0: i32, %arg1: i32, %arg2: i32) -> (i32, i32, i32) {
    %c0_i32 = arith.constant 0 : i32
    %c0_i32_0 = arith.constant 0 : i32
    %c0_i32_1 = arith.constant 0 : i32
    return %arg2, %c0_i32, %c0_i32_0 : i32, i32, i32
  }
  func.func @transform_17(%arg0: i32, %arg1: i32, %arg2: i32) -> (i32, i32, i32) {
    %c0_i32 = arith.constant 0 : i32
    %c0_i32_0 = arith.constant 0 : i32
    %c0_i32_1 = arith.constant 0 : i32
    return %arg2, %c0_i32, %c0_i32_0 : i32, i32, i32
  }
  func.func @transform_18(%arg0: i32, %arg1: i32, %arg2: i32) -> (i32, i32, i32) {
    %c0_i32 = arith.constant 0 : i32
    %c0_i32_0 = arith.constant 0 : i32
    %c0_i32_1 = arith.constant 0 : i32
    return %arg2, %c0_i32, %c0_i32_0 : i32, i32, i32
  }
  func.func @transform_19(%arg0: i32, %arg1: i32, %arg2: i32) -> (i32, i32, i32) {
    %c0_i32 = arith.constant 0 : i32
    %c0_i32_0 = arith.constant 0 : i32
    %c0_i32_1 = arith.constant 0 : i32
    return %arg2, %c0_i32, %c0_i32_0 : i32, i32, i32
  }
  func.func @transform_20(%arg0: i32, %arg1: i32, %arg2: i32) -> (i32, i32, i32) {
    %c0_i32 = arith.constant 0 : i32
    %c0_i32_0 = arith.constant 0 : i32
    return %arg0, %arg1, %c0_i32 : i32, i32, i32
  }
}

</mosaic_0001>

<bundles_post_ra>
// kernel: tpu_custom_call.1
= control target key start
LH: loop header
LB: loop body
LE: loop exit
PB: predicated region body
PF: predicated region fallthrough
CT: control target
= control target key end

     0   :  { %s4583_s0 = inlined_call_operand.hbm [shape: f32[2,8,128], index: 0, kind: input, shape index: {}]   ;;  %s4584_s1 = inlined_call_operand.hbm [shape: f32[2,8,128], index: 1, kind: input, shape index: {}]   ;;  %s4585_s2 = inlined_call_operand.hbm [shape: bf16[2,8,128], index: 2, kind: input, shape index: {}]   ;;  %s4586_s3 = inlined_call_operand.hbm [shape: bf16[2,8,128], index: 3, kind: input, shape index: {}]   ;;  %s4587_s4 = inlined_call_operand.hbm [shape: bf16[2,128,128], index: 4, kind: input, shape index: {}]   ;;  %s4588_s5 = inlined_call_operand.vmem [shape: f32[2,1,128], index: 5, kind: input, shape index: {}]   ;;  %s4589_s6 = inlined_call_operand.hbm [shape: bf16[2,128,128], index: 6, kind: input, shape index: {}]   ;;  %s4590_s7 = inlined_call_operand.vmem [shape: f32[2,1,128], index: 7, kind: input, shape index: {}]   ;;  %s4591_s8 = inlined_call_operand.hbm [shape: bf16[2,128,128], index: 8, kind: input, shape index: {}]   ;;  %s4592_s9 = inlined_call_operand.vmem [shape: f32[2,1,128], index: 9, kind: input, shape index: {}]   ;;  %s4593_s10 = inlined_call_operand.hbm [shape: bf16[2,128,128], index: 10, kind: input, shape index: {}]   ;;  %s4594_s11 = inlined_call_operand.vmem [shape: f32[2,1,128], index: 11, kind: input, shape index: {}]   ;;  %s4595_s12 = inlined_call_operand.hbm [shape: bf16[2,128,128], index: 12, kind: input, shape index: {}]   ;;  %s4596_s13 = inlined_call_operand.vmem [shape: f32[2,1,128], index: 13, kind: input, shape index: {}]   ;;  %s4597_s14 = inlined_call_operand.hbm [shape: bf16[2,128,128], index: 14, kind: input, shape index: {}]   ;;  %s4598_s15 = inlined_call_operand.vmem [shape: f32[2,1,128], index: 15, kind: input, shape index: {}]   ;;  %s4599_s16 = inlined_call_operand.vmem [shape: f32[2,1,128], index: 16, kind: input, shape index: {}]   ;;  %s4600_s17 = inlined_call_operand.vmem [shape: f32[2,1,128], index: 17, kind: input, shape index: {}]   ;;  %s4601_s18 = inlined_call_operand.hbm [shape: f32[2,1,128], index: 18, kind: input, shape index: {}]   ;;  %s4602_s19 = inlined_call_operand.vmem [shape: f32[2,1,128], index: 19, kind: input, shape index: {}]   ;;  %s4603_s20 = inlined_call_operand.hbm [shape: f32[2,8,128], index: 20, kind: output, shape index: {}]  }
   0x1   :  { %4642 = sst [smem:[#allocation50_spill]] %s4583_s0 }
   0x2   :  { %4643 = sst [smem:[#allocation51_spill]] %s4584_s1 }
   0x3   :  { %4644 = sst [smem:[#allocation52_spill]] %s4585_s2 }
   0x4   :  { %4645 = sst [smem:[#allocation53_spill]] %s4586_s3 }
   0x5   :  { %4646 = sst [smem:[#allocation54_spill]] %s4587_s4 }
   0x6   :  { %4647 = sst [smem:[#allocation55_spill]] %s4588_s5 }
   0x7   :  { %4648 = sst [smem:[#allocation56_spill]] %s4589_s6 }
   0x8   :  { %4649 = sst [smem:[#allocation57_spill]] %s4590_s7 }
   0x9   :  { %4650 = sst [smem:[#allocation58_spill]] %s4591_s8 }
   0xa   :  { %4651 = sst [smem:[#allocation59_spill]] %s4592_s9 }
   0xb   :  { %4652 = sst [smem:[#allocation60_spill]] %s4593_s10 }
   0xc   :  { %4653 = sst [smem:[#allocation61_spill]] %s4594_s11 }
   0xd   :  { %4654 = sst [smem:[#allocation62_spill]] %s4595_s12 }
   0xe   :  { %4655 = sst [smem:[#allocation63_spill]] %s4596_s13 }
   0xf   :  { %4656 = sst [smem:[#allocation64_spill]] %s4597_s14 }
  0x10   :  { %4657 = sst [smem:[#allocation65_spill]] %s4598_s15 }
  0x11   :  { %4658 = sst [smem:[#allocation66_spill]] %s4599_s16 }
  0x12   :  { %4659 = sst [smem:[#allocation67_spill]] %s4600_s17 }
  0x13   :  { %4660 = sst [smem:[#allocation68_spill]] %s4601_s18 }
  0x14   :  { %4661 = sst [smem:[#allocation69_spill]] %s4602_s19 }
  0x15   :  { %4662 = sst [smem:[#allocation70_spill]] %s4603_s20 }
  0x16   :  { %25 = vsyncpa [#allocation3], 0 }
  0x17   :  { %27 = vsyncpa [#allocation3 + $0x1], 0 }
  0x18   :  { %28 = vsyncpa [#allocation6], 0 }
  0x19   :  { %30 = vsyncpa [#allocation6 + $0x1], 0 }
  0x1a   :  { %31 = vsyncpa [#allocation9], 0 }
  0x1b   :  { %33 = vsyncpa [#allocation9 + $0x1], 0 }
  0x1c   :  { %34 = vsyncpa [#allocation12], 0 }
  0x1d   :  { %36 = vsyncpa [#allocation12 + $0x1], 0 }
  0x1e   :  { %37 = vsyncpa [#allocation15], 0 }
  0x1f   :  { %39 = vsyncpa [#allocation15 + $0x1], 0 }
  0x20   :  { %40 = vsyncpa [#allocation18], 0 }
  0x21   :  { %42 = vsyncpa [#allocation18 + $0x1], 0 }
  0x22   :  { %43 = vsyncpa [#allocation4], 0 }
  0x23   :  { %45 = vsyncpa [#allocation4 + $0x1], 0  ;;  %s3854_s1 = smov 0   ;;  %s3856_s22 = smov 0  }
  0x24   :  { %s3858_s23 = smov 0   ;;  %s3860_s24 = smov 0  }
  0x25   :  { %s3862_s2 = smov 0   ;;  %s3864_s25 = smov 0  }
  0x26   :  { %s3866_s3 = smov 0   ;;  %s3868_s26 = smov 0  }
  0x27   :  { %s3870_s27 = smov 0   ;;  %s3872_s28 = smov 0  }
  0x28   :  { %s3874_s4 = smov 0  }
  0x29 LB: > { %4663 = sst [smem:[#allocation29_spill]] %s3700_s22  ;;  %s3910_s29 = sadd.s32 4294967295, %s3736_s4   ;;  %s3736_s4 = sphi %s3874_s4, %s51_s4   ;;  %s3732_s28 = sphi %s3872_s28, %s4762_s28   ;;  %s3728_s27 = sphi %s3870_s27, %s4761_s27   ;;  %s3724_s26 = sphi %s3868_s26, %s4760_s26   ;;  %s3720_s3 = sphi %s3866_s3, %s4759_s3   ;;  %s3716_s25 = sphi %s3864_s25, %s4758_s25   ;;  %s3712_s2 = sphi %s3862_s2, %s4757_s2   ;;  %s3708_s24 = sphi %s3860_s24, %s4756_s24   ;;  %s3704_s23 = sphi %s3858_s23, %s4755_s23   ;;  %s3700_s22 = sphi %s3856_s22, %s4754_s22   ;;  %s3696_s1 = sphi %s3854_s1, %s4753_s1  }
  0x2a   : > { %4664 = sst [smem:[#allocation30_spill]] %s3704_s23  ;;  %s2844_s30 = sadd.s32 4294967294, %s3736_s4  }
  0x2b   : > { %4665 = sst [smem:[#allocation31_spill]] %s3708_s24  ;;  %s63_s0 = sadd.s32 1, %s3728_s27 }
  0x2c   : > { %4666 = sst [smem:[#allocation32_spill]] %s3712_s2  ;;  %s70_s21 = sadd.s32 1, %s3732_s28 }
  0x2d   : > { %4667 = sst [smem:[#allocation33_spill]] %s3716_s25  ;;  %p64_p0 = scmp.ge.s32.totalorder %s63_s0, 2 }
  0x2e   : > { %4668 = sst [smem:[#allocation34_spill]] %s3720_s3  ;;  %s79_s20 = sadd.s32 1, %s3716_s25 }
  0x2f   : > { %4669 = sst [smem:[#allocation35_spill]] %s3724_s26  ;;  %p86_p1 = scmp.ne.s32.totalorder %s3716_s25, %s3712_s2 }
  0x30   : > { %4670 = sst [smem:[#allocation36_spill]] %s3728_s27  ;;  %p87_p2 = scmp.eq.s32.totalorder %s3736_s4, 0 }
  0x31   : > { %4671 = sst [smem:[#allocation37_spill]] %s3732_s28  ;;  %s4764_s0 = smov (%p64_p0, %s63_s0), 0 }
  0x32   : > { %4672 = sst [smem:[#allocation38_spill]] %s3736_s4  ;;  %s4766_s21 = smov (!%p64_p0, %s70_s21), %s3732_s28 }
  0x33   : > { %4673 = sst [smem:[#allocation39_spill]] %s4764_s0  ;;  %p3927_p3 = por %p87_p2, %p86_p1 }
  0x34   : > { %p4606_p4 = scmp.ne.s32.totalorder %s3712_s2, %s3708_s24  ;;  %p72_p5 = scmp.ge.s32.totalorder %s4766_s21, 2 }
  0x35   : > { %p93_p6 = scmp.eq.s32.totalorder %s3910_s29, 0  ;;  %s182_s19 = ssub.s32 %s3728_s27, %s4764_s0 }
  0x36   : > { %s185_s17 = sadd.s32 1, %s3704_s23  ;;  %s4768_s21 = smov (%p72_p5, %s4766_s21), 0 }
  0x37   : > { %4675 = sst [smem:[#allocation40_spill]] %s4768_s21  ;;  %p3944_p7 = por %p93_p6, %p4606_p4 }
  0x38   : > { %p183_p8 = scmp.eq.s32.totalorder %s182_s19, 0  ;;  %s74_s15 = ssub.s32 %s3732_s28, %s4768_s21 }
  0x39   : > { %p192_p9 = scmp.ne.s32.totalorder %s3704_s23, %s3700_s22  ;;  %p77_p10 = scmp.eq.s32.totalorder %s74_s15, 0 }
  0x3a   : > { %p198_p11 = scmp.ne.s32.totalorder %s3700_s22, %s3696_s1  ;;  %p614_p0 = scmp.eq.s32.totalorder %s3910_s29, 3 }
  0x3b   : > { %s3955_s13 = scalar_select %p183_p8, %s3704_s23, %s185_s17  }
  0x3c   : > { %s3958_s0 = scalar_select %p77_p10, %s3716_s25, %s79_s20  }
  0x3d   : > { %4677 = sst [smem:[#allocation41_spill]] %s3955_s13  ;;  %p3962_p12 = por %p192_p9, %p87_p2 }
  0x3e   : > { %4678 = sst [smem:[#allocation42_spill]] %s3958_s0  ;;  %p3968_p13 = por %p198_p11, %p93_p6 }
  0x3f   : > { %p620_p5 = scmp.eq.s32.totalorder %s2844_s30, 3  ;;  %p3976_p4 = por %p614_p0, %p86_p1 }
  0x40   : > { %s4680_s9 = scalar_select %p3968_p13, 1, 0 }
  0x41   : > { %s4682_s15 = scalar_select %p3976_p4, 1, 0 }
  0x42   : > { %4681 = sst [smem:[#allocation43_spill]] %s4680_s9  ;;  %p4684_p8 = scmp.ne.s32.totalorder %s3712_s2, %s3708_s24 }
  0x43   : > { %4683 = sst [smem:[#allocation44_spill]] %s4682_s15  ;;  %p2846_p2 = scmp.ge.s32.totalorder %s3736_s4, 4 }
  0x44   : > { %p3983_p10 = por %p620_p5, %p4684_p8  ;;  %s3989_s19 = sand.u32 (!%p2846_p2), 1, %s3716_s25  }
  0x45   : > { %636 = sbr.rel (%p2846_p2) target bundleno = 124 (0x7c), region = 16  ;;  %s4613_s20 = sshll.u32 (!%p2846_p2), %s3732_s28, 3 }
  0x46   : > { %s4685_s17 = scalar_select %p3983_p10, 1, 0 }
  0x47   : > { %s4614_s1 = sshll.u32 (!%p2846_p2), %s3989_s19, 3  ;;  %s3994_s30 = sand.u32 (!%p2846_p2), 1, %s3736_s4  }
  0x48   : > { %4686 = sst [smem:[#allocation45_spill]] %s4685_s17  ;;  %s664_s24 = scalar_lea.vmem (!%p2846_p2), [#allocation5], %s4614_s1 }
  0x49   : > { %s4687_s13 = sld [smem:[#allocation51_spill]] (!%p2846_p2)  ;;  %s673_s25 = sshll.u32 (!%p2846_p2), %s664_s24, 4  ;;  %s674_s25 = int_to_ptr.vmem [resolvable:$true] %s673_s25 }
  0x4a   : > { %s4621_s7 = sshll.u32 %s3989_s19, 2  ;;  %s4618_s5 = scalar_lea.sflag [#allocation6], %s3994_s30 }
  0x4b   : > { %s4622_s0 = sshll.u32 %s3732_s28, 2  ;;  %s703_s24 = scalar_lea.vmem [#allocation8], %s4621_s7 }
  0x4c   : > { %s4619_s9 = scalar_lea.sflag [#allocation9], %s3994_s30  ;;  %s4689_s6 = sld [smem:[#allocation56_spill]] }
  0x4d   : > { %s4690_s10 = sld [smem:[#allocation60_spill]]  ;;  %s641_s22 = scalar_lea.sflag [#allocation3], %s3989_s19 }
  0x4e   : > { %s4691_s14 = sld [smem:[#allocation64_spill]]  ;;  %s4701_s26 = scalar_lea.sflag [#allocation9], %s3994_s30 }
  0x4f   : > { %s669_s17 = scalar_lea.hbm %s4687_s13, %s4613_s20  ;;  %s4688_s20 = sld [smem:[#allocation53_spill]] }
  0x50   : > { %s671_s15 = sshll.u32 %s669_s17, 4  ;;  %s711_s17 = sshll.u32 %s703_s24, 4  ;;  %s672_s15 = int_to_ptr.hbm [resolvable:$true] %s671_s15  ;;  %s712_s17 = int_to_ptr.vmem [resolvable:$true] %s711_s17 }
  0x51   : > { %3117 = dma.hbm_to_vmem [thread:$0]  (%p3927_p3), %s672_s15, 128, %s674_s25, %s4618_s5  }
  0x52   : > { %s4620_s25 = sand.u32 1, %s3704_s23   ;;  %s4024_s15 = sshll.u32 %s3728_s27, 6 }
  0x53   : > { %s755_s21 = scalar_lea.hbm %s4689_s6, %s4024_s15  ;;  %s4624_s6 = scalar_lea.sflag [#allocation15], %s3994_s30 }
  0x54   : > { %s756_s24 = sshll.u32 %s755_s21, 4  ;;  %s811_s21 = scalar_lea.hbm %s4690_s10, %s4024_s15  ;;  %s757_s24 = int_to_ptr.hbm [resolvable:$true] %s756_s24 }
  0x55   : > { %s707_s1 = scalar_lea.hbm %s4688_s20, %s4622_s0  ;;  %s4028_s20 = sshll.u32 %s4620_s25, 6 }
  0x56   : > { %s709_s3 = sshll.u32 %s707_s1, 4  ;;  %s750_s5 = scalar_lea.vmem [#allocation11], %s4028_s20  ;;  %s710_s3 = int_to_ptr.hbm [resolvable:$true] %s709_s3 }
  0x57   : > { %3119 = dma.hbm_to_vmem [thread:$0]  (%p3927_p3), %s710_s3, 64, %s712_s17, %s4619_s9  }
  0x58   : > { %s758_s3 = sshll.u32 %s750_s5, 4  ;;  %s4623_s17 = scalar_lea.sflag [#allocation12], %s3994_s30  ;;  %s759_s3 = int_to_ptr.vmem [resolvable:$true] %s758_s3 }
  0x59   : > { %s4628_s9 = smov 64   ;;  %s3739_s25 = smov 4  }
  0x5a   : > { %3121 = dma.hbm_to_vmem [thread:$0]  (%p3962_p12), %s757_s24, 1024, %s759_s3, %s4623_s17, %s4628_s9, %s4628_s9, %s3739_s25  }
  0x5b   : > { %s806_s5 = scalar_lea.vmem [#allocation14], %s4028_s20  ;;  %s812_s0 = sshll.u32 %s811_s21, 4  ;;  %s813_s0 = int_to_ptr.hbm [resolvable:$true] %s812_s0 }
  0x5c   : > { %s814_s7 = sshll.u32 %s806_s5, 4  ;;  %s867_s1 = scalar_lea.hbm %s4691_s14, %s4024_s15  ;;  %s815_s7 = int_to_ptr.vmem [resolvable:$true] %s814_s7 }
  0x5d   : > { %3123 = dma.hbm_to_vmem [thread:$0]  (%p3962_p12), %s813_s0, 1024, %s815_s7, %s4624_s6, %s4628_s9, %s4628_s9, %s3739_s25  }
  0x5e   : > { %s868_s13 = sshll.u32 %s867_s1, 4  ;;  %s862_s5 = scalar_lea.vmem [#allocation17], %s4028_s20  ;;  %s869_s13 = int_to_ptr.hbm [resolvable:$true] %s868_s13 }
  0x5f   : > { %s870_s21 = sshll.u32 %s862_s5, 4  ;;  %s4627_s17 = scalar_lea.sflag [#allocation18], %s3994_s30  ;;  %s871_s21 = int_to_ptr.vmem [resolvable:$true] %s870_s21 }
  0x60   : > { %3125 = dma.hbm_to_vmem [thread:$0]  (%p3962_p12), %s869_s13, 1024, %s871_s21, %s4627_s17, %s4628_s9, %s4628_s9, %s3739_s25  }
  0x61   : > { %s4692_s7 = sshll.u32 %s3732_s28, 3  ;;  %s4693_s3 = sld [smem:[#allocation50_spill]] }
  0x62   : > { %s4694_s6 = sshll.u32 %s3989_s19, 3  ;;  %s4695_s13 = sshll.u32 %s3732_s28, 2 }
  0x63   : > { %s644_s5 = scalar_lea.vmem [#allocation2], %s4694_s6  ;;  %s4696_s9 = sld [smem:[#allocation52_spill]] }
  0x64   : > { %s653_s10 = sshll.u32 %s644_s5, 4  ;;  %s722_s17 = scalar_lea.vmem [#allocation10], %s4028_s20  ;;  %s654_s10 = int_to_ptr.vmem [resolvable:$true] %s653_s10 }
  0x65   : > { %s730_s21 = sshll.u32 %s722_s17, 4  ;;  %s4702_s8 = sld [smem:[#allocation58_spill]]  ;;  %s731_s21 = int_to_ptr.vmem [resolvable:$true] %s730_s21 }
  0x66   : > { %s4704_s12 = sld [smem:[#allocation62_spill]] }
  0x67   : > { %s649_s1 = scalar_lea.hbm %s4693_s3, %s4692_s7  ;;  %s4697_s7 = sshll.u32 %s3989_s19, 2 }
  0x68   : > { %s651_s14 = sshll.u32 %s649_s1, 4  ;;  %s684_s24 = scalar_lea.vmem [#allocation7], %s4697_s7  ;;  %s652_s14 = int_to_ptr.hbm [resolvable:$true] %s651_s14 }
  0x69   : > { %3116 = dma.hbm_to_vmem [thread:$0]  (%p3927_p3), %s652_s14, 128, %s654_s10, %s641_s22  }
  0x6a   : > { %s688_s0 = scalar_lea.hbm %s4696_s9, %s4695_s13  ;;  %s692_s3 = sshll.u32 %s684_s24, 4  ;;  %s693_s3 = int_to_ptr.vmem [resolvable:$true] %s692_s3 }
  0x6b   : > { %s690_s6 = sshll.u32 %s688_s0, 4  ;;  %s4698_s1 = scalar_lea.sflag [#allocation6], %s3994_s30  ;;  %s691_s6 = int_to_ptr.hbm [resolvable:$true] %s690_s6 }
  0x6c   : > { %3118 = dma.hbm_to_vmem [thread:$0]  (%p3927_p3), %s691_s6, 64, %s693_s3, %s4698_s1  }
  0x6d   : > { %s4699_s14 = sld [smem:[#allocation54_spill]]  ;;  %s4700_s19 = smov 64  }
  0x6e   : > { %s783_s7 = scalar_lea.hbm %s4702_s8, %s4024_s15  ;;  %s778_s24 = scalar_lea.vmem [#allocation13], %s4028_s20 }
  0x6f   : > { %s786_s3 = sshll.u32 %s778_s24, 4  ;;  %s784_s6 = sshll.u32 %s783_s7, 4  ;;  %s787_s3 = int_to_ptr.vmem [resolvable:$true] %s786_s3  ;;  %s785_s6 = int_to_ptr.hbm [resolvable:$true] %s784_s6 }
  0x70   : > { %s4703_s1 = scalar_lea.sflag [#allocation12], %s3994_s30  ;;  %s4706_s18 = sld [smem:[#allocation68_spill]] }
  0x71   : > { %3122 = dma.hbm_to_vmem [thread:$0]  (%p3962_p12), %s785_s6, 1024, %s787_s3, %s4703_s1, %s4700_s19, %s4700_s19, %s3739_s25  }
  0x72   : > { %s4707_s7 = sand.u32 1, %s3704_s23  }
  0x73   : > { %s727_s22 = scalar_lea.hbm %s4699_s14, %s4024_s15  ;;  %s839_s14 = scalar_lea.hbm %s4704_s12, %s4024_s15 }
  0x74   : > { %s728_s9 = sshll.u32 %s727_s22, 4  ;;  %s834_s22 = scalar_lea.vmem [#allocation16], %s4028_s20  ;;  %s729_s9 = int_to_ptr.hbm [resolvable:$true] %s728_s9 }
  0x75   : > { %3120 = dma.hbm_to_vmem [thread:$0]  (%p3962_p12), %s729_s9, 1024, %s731_s21, %s4701_s26, %s4700_s19, %s4700_s19, %s3739_s25  }
  0x76   : > { %s842_s17 = sshll.u32 %s834_s22, 4  ;;  %s840_s21 = sshll.u32 %s839_s14, 4  ;;  %s843_s17 = int_to_ptr.vmem [resolvable:$true] %s842_s17  ;;  %s841_s21 = int_to_ptr.hbm [resolvable:$true] %s840_s21 }
  0x77   : > { %s4705_s9 = scalar_lea.sflag [#allocation15], %s3994_s30  ;;  %s904_s0 = scalar_lea.hbm %s4706_s18, %s3728_s27 }
  0x78   : > { %3124 = dma.hbm_to_vmem [thread:$0]  (%p3962_p12), %s841_s21, 1024, %s843_s17, %s4705_s9, %s4700_s19, %s4700_s19, %s3739_s25  }
  0x79   : > { %s901_s24 = scalar_lea.vmem [#allocation19], %s4707_s7  ;;  %s906_s6 = sshll.u32 %s904_s0, 4  ;;  %s907_s6 = int_to_ptr.hbm [resolvable:$true] %s906_s6 }
  0x7a   : > { %s908_s3 = sshll.u32 %s901_s24, 4  ;;  %s4708_s15 = scalar_lea.sflag [#allocation18], %s3994_s30  ;;  %s909_s3 = int_to_ptr.vmem [resolvable:$true] %s908_s3 }
  0x7b   : > { %3126 = dma.hbm_to_vmem [thread:$0]  (%p3962_p12), %s907_s6, 16, %s909_s3, %s4708_s15  }
  0x7c PF: > { %p2873_p1 = scmp.ge.s32.totalorder %s3736_s4, 1  ;;  %p919_p3 = scmp.lt.s32.totalorder %s3736_s4, 5 }
  0x7e   : > { %p920_p6 = pnand %p2873_p1, %p919_p3 }
  0x80   : > { %923 = sbr.rel (%p920_p6) target bundleno = 2005 (0x7d5), region = 100 }
  0x85   : > { %s4139_s25 = sand.u32 1, %s3712_s2  }
  0x86   : > { %4709 = sst [smem:[#allocation46_spill]] %s4139_s25  ;;  %s4142_s20 = sshll.u32 %s4139_s25, 3 }
  0x87   : > { %s926_s19 = scalar_lea.sflag [#allocation3], %s4139_s25 }
  0x88   : > { %3663 = dma.done.wait (%p3944_p7), %s926_s19, 128  }
  0x89   : > { %3665 = vsyncadd (%p3944_p7), %s926_s19, 4294967168  ;;  %s4151_s30 = sand.u32 1, %s3910_s29  }
  0x8a   : > { %s936_s1 = scalar_lea.sflag [#allocation6], %s4151_s30 }
  0x8b   : > { %3667 = dma.done.wait (%p3944_p7), %s936_s1, 192  }
  0x8c   : > { %3669 = vsyncadd (%p3944_p7), %s936_s1, 4294967104  ;;  %s2876_s10 = sshll.u32 %s4139_s25, 2  ;;  %s956_s22 = scalar_lea.sflag [#allocation9], %s4151_s30 }
  0x8d   : > { %s4160_s14 = scalar_lea.vmem [#allocation7], %s2876_s10  ;;  %s4163_s17 = scalar_lea.vmem [#allocation8], %s2876_s10 }
  0x8e   : > { %3671 = dma.done.wait (%p3944_p7), %s956_s22, 64  }
  0x8f   : > { %3673 = vsyncadd (%p3944_p7), %s956_s22, 4294967232  ;;  %s4710_s29 = sld [smem:[#allocation29_spill]] }
  0x95   : > { %s4630_s9 = sand.u32 1, %s4710_s29  }
  0x96   : > { %s4172_s26 = sshll.u32 %s4630_s9, 6 }
  0x97   : > { %4712 = sst [smem:[#allocation47_spill]] %s4172_s26  ;;  %s4175_s13 = scalar_lea.vmem [#allocation10], %s4172_s26 }
  0x98   : > { %3675 = dma.done.wait (%p3968_p13), %s956_s22, 1024  }
  0x99   : > { %3677 = vsyncadd (%p3968_p13), %s956_s22, 4294966272  ;;  %s976_s16 = scalar_lea.sflag [#allocation12], %s4151_s30  ;;  %s4183_s0 = scalar_lea.vmem [#allocation11], %s4172_s26 }
  0x9a   : > { %3679 = dma.done.wait (%p3968_p13), %s976_s16, 2048  }
  0x9b   : > { %3681 = vsyncadd (%p3968_p13), %s976_s16, 4294965248  ;;  %s4190_s7 = scalar_lea.vmem [#allocation13], %s4172_s26  ;;  %s996_s24 = scalar_lea.sflag [#allocation15], %s4151_s30 }
  0x9c   : > { %3683 = dma.done.wait (%p3968_p13), %s996_s24, 2048  }
  0x9d   : > { %3685 = vsyncadd (%p3968_p13), %s996_s24, 4294965248  ;;  %s4199_s6 = scalar_lea.vmem [#allocation16], %s4172_s26  ;;  %s1016_s15 = scalar_lea.sflag [#allocation18], %s4151_s30 }
  0x9e   : > { %4713 = sst [smem:[#allocation48_spill]] %s4199_s6  ;;  %s4203_s19 = scalar_lea.vmem [#allocation17], %s4172_s26 }
  0x9f   : > { %4714 = sst [smem:[#allocation49_spill]] %s4203_s19 }
  0xa0   : > { %3687 = dma.done.wait (%p3968_p13), %s1016_s15, 1040  }
  0xa1   : > { %3689 = vsyncadd (%p3968_p13), %s1016_s15, 4294966256  ;;  %s4715_s1 = sld [smem:[#allocation34_spill]]  ;;  %s4725_s22 = sand.u32 1, %s4710_s29  }
  0xa2   : > { %s4720_s23 = sld [smem:[#allocation63_spill]]  ;;  %s4251_s16 = scalar_lea.vmem [#allocation19], %s4725_s22 }
  0xa3   : > { %s4721_s6 = sld [smem:[#allocation65_spill]] }
  0xa4   : > { %s4722_s21 = sld [smem:[#allocation66_spill]] }
  0xa5   : > { %s4723_s11 = sld [smem:[#allocation67_spill]] }
  0xa6   : > { %s4724_s18 = sld [smem:[#allocation69_spill]] }
  0xa7   : > { %p1162_p7 = scmp.lt.s32.totalorder %s4715_s1, 1  ;;  %p2885_p9 = scmp.ne.s32.totalorder %s4715_s1, 0 }
  0xa8   : > { %s4726_s2 = scalar_lea.vmem (!%p2885_p9), [#allocation2], %s4142_s20 }
  0xa9   : > { %s4211_s10 = scalar_select %p1162_p7, %s4715_s1, 1 }
  0xaa   : > { %1193 = sbr.rel (%p2885_p9) target bundleno = 177 (0xb1), region = 148 }
  0xab   : > { %s1176_s4 = scalar_lea.vmem %s4720_s23, %s4211_s10  ;;  %s1179_s24 = scalar_lea.vmem %s4721_s6, %s4211_s10 }
  0xac   : > { %s1182_s3 = scalar_lea.vmem %s4722_s21, %s4211_s10  ;;  %s1185_s8 = scalar_lea.vmem %s4723_s11, %s4211_s10 }
  0xad   : > { %s1188_s28 = scalar_lea.vmem %s4724_s18, %s4211_s10  ;;  %s4254_s23 = scalar_lea.vmem [#allocation20], %s4142_s20 }
  0xaf   : > { %v1194_v0 = vld [vmem:[%s4726_s2] sm:$0xff] }
  0xb0   : > { %1195 = vst [vmem:[%s4254_s23] sm:$0xff] %v1194_v0 }
  0xb1 PF: > { %v3089_v1 = vld [vmem:[%s4183_s0 + $0x38] sm:$0xff]  ;;  %v3088_v3 = vld [vmem:[%s4183_s0 + $0x30] sm:$0xff]  ;;  %v3087_v5 = vld [vmem:[%s4183_s0 + $0x28] sm:$0xff]  ;;  %s4727_s12 = scalar_lea.vmem [#allocation5], %s4142_s20  ;;  %s4728_s20 = sld [smem:[#allocation57_spill]]  ;;  %vm1481_vm0 = vcmask 1047556  }
  0xb2   : > { %v3081_v2 = vld [vmem:[%s4175_s13 + $0x38] sm:$0xff]  ;;  %1355 = vmatpush.bf16.msra.mxu1 %v3089_v1  ;;  %v3080_v4 = vld [vmem:[%s4175_s13 + $0x30] sm:$0xff]  ;;  %v3079_v6 = vld [vmem:[%s4175_s13 + $0x28] sm:$0xff]  ;;  %s4732_s1 = sld [smem:[#allocation59_spill]]  ;;  %v3743_v46 = vmov 1983009808  }
  0xb3   : > { %1273 = vmatpush.bf16.msra.mxu0 %v3081_v2  ;;  %v3097_v7 = vld [vmem:[%s4190_s7 + $0x38] sm:$0xff]  ;;  %v3086_v8 = vld [vmem:[%s4183_s0 + $0x20] sm:$0xff]  ;;  %v3096_v10 = vld [vmem:[%s4190_s7 + $0x30] sm:$0xff]  ;;  %v1472_v47 = vunpack.c.l.s4 %v3743_v46  ;;  %v3744_v63 = vmov 1934713408   ;;  %vm1817_vm1 = vcmask 64512  }
  0xb4   : > { %v3078_v9 = vld [vmem:[%s4175_s13 + $0x20] sm:$0xff]  ;;  %1437 = vmatpush.bf16.msra.mxu2 %v3097_v7  ;;  %v3095_v11 = vld [vmem:[%s4190_s7 + $0x28] sm:$0xff]  ;;  %v3085_v12 = vld [vmem:[%s4183_s0 + $0x18] sm:$0xff]  ;;  %v1486_v0 = vunpack.c.l.s4 %v3744_v63  ;;  %vm1965_vm2 = vcmask 1043456   ;;  %s4734_s21 = sld [smem:[#allocation47_spill]]  ;;  %s3745_s15 = smov 16  }
  0xb5   : > { %v3077_v13 = vld [vmem:[%s4175_s13 + $0x18] sm:$0xff]  ;;  %v3094_v14 = vld [vmem:[%s4190_s7 + $0x20] sm:$0xff]  ;;  %v3084_v15 = vld [vmem:[%s4183_s0 + $0x10] sm:$0xff]  ;;  %v4312_v51 = vunpack.c.0.s8 %v1472_v47  ;;  %s3746_s11 = smov 24   ;;  %s3747_s9 = smov 8   ;;  %vm2175_vm3 = vcmask 130048  }
  0xb6   : > { %1356 = vmatpush.bf16.msra.mxu1 %v3088_v3  ;;  %v3076_v16 = vld [vmem:[%s4175_s13 + $0x10] sm:$0xff]  ;;  %v3093_v17 = vld [vmem:[%s4190_s7 + $0x18] sm:$0xff]  ;;  %v3083_v18 = vld [vmem:[%s4183_s0 + $0x8] sm:$0xff]  ;;  %vm2177_vm4 = vcmask 195584   ;;  %s4737_s2 = sld [smem:[#allocation48_spill]]  ;;  %vm2200_vm5 = vcmask 261120  }
  0xb7   : > { %1274 = vmatpush.bf16.msra.mxu0 %v3080_v4  ;;  %v3075_v19 = vld [vmem:[%s4175_s13 + $0x8] sm:$0xff]  ;;  %v3092_v22 = vld [vmem:[%s4190_s7 + $0x10] sm:$0xff]  ;;  %v3082_v24 = vld [vmem:[%s4183_s0] sm:$0xff]  ;;  %s4729_s5 = scalar_lea.vmem %s4728_s20, %s4211_s10  ;;  %s4738_s25 = sld [smem:[#allocation61_spill]] }
  0xb8   : > { %1438 = vmatpush.bf16.msra.mxu2 %v3096_v10  ;;  %v4280_v20 = vld [vmem:[%s4254_s23] sm:$0xff]  ;;  %v1286_v27 = vld [vmem:[%s4160_s14] sm:$0xf]  ;;  %v1368_v30 = vld [vmem:[%s4163_s17] sm:$0xf]  ;;  %s3740_s14 = smov 104   ;;  %s4733_s30 = scalar_lea.vmem %s4732_s1, %s4211_s10 }
  0xb9   : > { %v1202_v21 = vld [vmem:[%s4727_s12] sm:$0xff]  ;;  %v3244_v31 = vld [vmem:[%s4729_s5] ss:$0 sm:$0xff]  ;;  %s3741_s17 = smov 120   ;;  %s4740_s5 = sld [smem:[#allocation49_spill]] }
  0xba   : > { %1357 = vmatpush.bf16.msra.mxu1 %v3087_v5  ;;  %v1203_v23 = vadd.f32 %v1202_v21, %v4280_v20  ;;  %v3074_v25 = vld [vmem:[%s4175_s13] sm:$0xff]  ;;  %v3091_v28 = vld [vmem:[%s4190_s7 + $0x8] sm:$0xff]  ;;  %s4730_s13 = sld [smem:[#allocation55_spill]]  ;;  %v3246_v42 = vld [vmem:[%s4733_s30] ss:$0 sm:$0xff]  ;;  %s4735_s18 = scalar_lea.vmem [#allocation14], %s4734_s21 }
  0xbb   : > { %1275 = vmatpush.bf16.msra.mxu0 %v3079_v6  ;;  %v3090_v29 = vld [vmem:[%s4190_s7] sm:$0xff]  ;;  %s3742_s7 = smov 112   ;;  %s4736_s22 = smov %s4735_s18 }
  0xbc   : > { %1439 = vmatpush.bf16.msra.mxu2 %v3095_v11  ;;  %v1204_v26 = vpack.c.bf16 %v1203_v23, %v1203_v23  ;;  %s4745_s30 = sld [smem:[#allocation35_spill]]  ;;  %s2461_s27 = sshll.u32 %s4254_s23, 4  ;;  %s2462_s27 = int_to_ptr.vmem [resolvable:$true] %s2461_s27 }
  0xbd   : > { %s4739_s20 = scalar_lea.vmem %s4738_s25, %s4211_s10 }
  0xbe   : > { %1358 = vmatpush.bf16.msra.mxu1 %v3086_v8 }
  0xbf   : > { %1276 = vmatpush.bf16.msra.mxu0 %v3078_v9 }
  0xc0   : > { %1440 = vmatpush.bf16.msra.mxu2 %v3094_v14  ;;  %s4731_s0 = scalar_lea.vmem %s4730_s13, %s4211_s10 }
  0xc1   : > { %v3245_v32 = vld [vmem:[%s4731_s0] ss:$0 sm:$0xff] }
  0xc2   : > { %1359 = vmatpush.bf16.msra.mxu1 %v3085_v12 }
  0xc3   : > { %1277 = vmatpush.bf16.msra.mxu0 %v3077_v13  ;;  %v4318_v13 = vunpack.c.0.s8 %v1486_v0 }
  0xc4   : > { %1441 = vmatpush.bf16.msra.mxu2 %v3093_v17 }
  0xc6   : > { %1360 = vmatpush.bf16.msra.mxu1 %v3084_v15 }
  0xc7   : > { %1278 = vmatpush.bf16.msra.mxu0 %v3076_v16 }
  0xc8   : > { %1442 = vmatpush.bf16.msra.mxu2 %v3092_v22 }
  0xca   : > { %1361 = vmatpush.bf16.msra.mxu1 %v3083_v18 }
  0xcb   : > { %1279 = vmatpush.bf16.msra.mxu0 %v3075_v19 }
  0xcc   : > { %1443 = vmatpush.bf16.msra.mxu2 %v3091_v28 }
  0xce   : > { %1362 = vmatpush.bf16.msra.mxu1 %v3082_v24 }
  0xcf   : > { %1280 = vmatpush.bf16.msra.mxu0 %v3074_v25 }
  0xd0   : > { %1444 = vmatpush.bf16.msra.mxu2 %v3090_v29 }
  0xd1   : > { %1363 = vmatmul.bf16.vlgmr.msra.gmra.mxu1 %v1286_v27 }
  0xd2   : > { %1281 = vmatmul.bf16.vlgmr.msra.gmra.mxu0 %v1204_v26 }
  0xd3   : > { %1445 = vmatmul.bf16.vlgmr.msra.gmra.mxu2 %v1368_v30 }
 0x14e   : > { %v1364_v33 = vpop.f32.mrf.mxu1 }
 0x14f   : > { %v1282_v34 = vpop.f32.mrf.mxu0  ;;  %v1365_v35 = vadd.f32 %v3244_v31, %v1364_v33 }
 0x150   : > { %v1283_v36 = vadd.f32 %v3245_v32, %v1282_v34 }
 0x151   : > { %v1573_v37 = vpack.c.bf16 %v1365_v35, %v1365_v35 }
 0x152   : > { %v1450_v38 = vpack.c.bf16 %v1283_v36, %v1283_v36 }
 0x153   : > { %1579 = vrot.lane.b32.xlu1 %v1573_v37, %s3740_s14  ;;  %1575 = vrot.lane.b32.xlu0 %v1573_v37, %s3741_s17  ;;  %v1584_v52 = vshrl.u32 %v1573_v37, 16 }
 0x154   : > { %1454 = vrot.lane.b32.xlu2 %v1450_v38, %s3742_s7  ;;  %v1461_v5 = vshrl.u32 %v1450_v38, 16 }
 0x156   : > { %v1366_v39 = vpop.f32.mrf.mxu1  ;;  %v1446_v43 = vpop.f32.mrf.mxu2 }
 0x157   : > { %v1284_v40 = vpop.f32.mrf.mxu0  ;;  %v1447_v44 = vadd.f32 %v3246_v42, %v1446_v43 }
 0x159   : > { %v4307_v45 = vpack.c.bf16 %v1447_v44, %v1447_v44 }
 0x15b   : > { %1577 = vrot.lane.b32.xlu0 %v1573_v37, %s3742_s7  ;;  %1452 = vrot.lane.b32.xlu1 %v1450_v38, %s3741_s17 }
 0x15c   : > { %1456 = vrot.lane.b32.xlu2 %v1450_v38, %s3740_s14 }
 0x15e   : > { %v1448_v54 = vpop.f32.mrf.mxu2 }
 0x163   : > { %1697 = vrot.lane.b32.xlu0 %v4307_v45, %s3741_s17  ;;  %1699 = vrot.lane.b32.xlu1 %v4307_v45, %s3742_s7 }
 0x164   : > { %1701 = vrot.lane.b32.xlu2 %v4307_v45, %s3740_s14 }
 0x1ae   : > { %v1455_v41 = vpop.permute.xlu2 %1454 }
 0x1af   : > { %v1467_v55 = vshrl.u32 %v1455_v41, 16 }
 0x1b6   : > { %v1457_v48 = vpop.permute.xlu2 %1456 }
 0x1b7   : > { %v1466_v56 = vpack.i.b16 %v1457_v48, %v1455_v41  ;;  %v1468_v57 = vshrl.u32 %v1457_v48, 16 }
 0x1b9   : > { %v1469_v60 = vpack.i.b16 %v1468_v57, %v1467_v55  ;;  %v1479_v61 = vperm.slane %v1466_v56, %v4312_v51 }
 0x1bb   : > { %v1480_v10 = vrot.slane %v1479_v61, 4  ;;  %v1506_v11 = vperm.slane %v1469_v60, %v4312_v51 }
 0x1bd   : > { %v1507_v24 = vrot.slane %v1506_v11, 4 }
 0x1c5   : > { %v1580_v49 = vpop.permute.xlu1 %1579  ;;  %v1576_v50 = vpop.permute.xlu0 %1575 }
 0x1c6   : > { %v1585_v53 = vshrl.u32 %v1576_v50, 16  ;;  %v1583_v58 = vpack.i.b16 %v1576_v50, %v1573_v37  ;;  %v1591_v1 = vshrl.u32 %v1580_v49, 16 }
 0x1c8   : > { %v1586_v59 = vpack.i.b16 %v1585_v53, %v1584_v52  ;;  %v1597_v62 = vperm.slane %v1583_v58, %v4312_v51 }
 0x1ca   : > { %v1623_v2 = vperm.slane %v1586_v59, %v4312_v51  ;;  %v1605_v12 = vrot.slane %v1597_v62, 4 }
 0x1cc   : > { %v1631_v18 = vrot.slane %v1623_v2, 4 }
 0x1cd   : > { %v1578_v3 = vpop.permute.xlu0 %1577  ;;  %v1453_v4 = vpop.permute.xlu1 %1452 }
 0x1ce   : > { %v1589_v6 = vpack.i.b16 %v1580_v49, %v1578_v3  ;;  %v1590_v7 = vshrl.u32 %v1578_v3, 16  ;;  %v1460_v8 = vpack.i.b16 %v1453_v4, %v1450_v38  ;;  %v1462_v9 = vshrl.u32 %v1453_v4, 16 }
 0x1d0   : > { %v1592_v14 = vpack.i.b16 %v1591_v1, %v1590_v7  ;;  %v1602_v15 = vperm.slane %v1589_v6, %v4312_v51  ;;  %v1463_v16 = vpack.i.b16 %v1462_v9, %v1461_v5  ;;  %v1474_v17 = vperm.slane %v1460_v8, %v4312_v51 }
 0x1d2   : > { %v1603_v19 = vrot.slane %v1602_v15, 4  ;;  %v1606_v21 = vsel %vm1481_vm0, %v1602_v15, %v1605_v12  ;;  %v1628_v22 = vperm.slane %v1592_v14, %v4312_v51  ;;  %v1482_v23 = vsel %vm1481_vm0, %v1480_v10, %v1474_v17 }
 0x1d3   : > { %v1614_v25 = vperm.slane %v1606_v21, %v4318_v13  ;;  %v1483_v26 = vrot.slane %v1474_v17, 4  ;;  %v1501_v27 = vperm.slane %v1463_v16, %v4312_v51  ;;  %v1488_v31 = vperm.slane %v1482_v23, %v4318_v13 }
 0x1d4   : > { %v1604_v28 = vsel %vm1481_vm0, %v1603_v19, %v1597_v62  ;;  %v1629_v29 = vrot.slane %v1628_v22, 4  ;;  %v1632_v30 = vsel %vm1481_vm0, %v1628_v22, %v1631_v18 }
 0x1d5   : > { %v1610_v32 = vperm.slane %v1604_v28, %v4318_v13  ;;  %v1617_v33 = vrot.slane %v1614_v25, 4  ;;  %v1640_v34 = vperm.slane %v1632_v30, %v4318_v13  ;;  %v1484_v35 = vsel %vm1481_vm0, %v1479_v61, %v1483_v26 }
 0x1d6   : > { %v1630_v36 = vsel %vm1481_vm0, %v1629_v29, %v1623_v2  ;;  %v1492_v37 = vperm.slane %v1484_v35, %v4318_v13  ;;  %v1508_v38 = vsel %vm1481_vm0, %v1507_v24, %v1501_v27  ;;  %v1493_v44 = vrot.slane %v1488_v31, 4 }
 0x1d7   : > { %v1615_v39 = vrot.slane %v1610_v32, 4  ;;  %v1618_v40 = vsel %vm1481_vm0, 0, %v1617_v33  ;;  %v1636_v41 = vperm.slane %v1630_v36, %v4318_v13  ;;  %v1643_v42 = vrot.slane %v1640_v34, 4 }
 0x1d8   : > { %v1650_v43 = vrot.slane %v1618_v40, 4  ;;  %v1495_v46 = vrot.slane %v1492_v37, 4  ;;  %v1509_v47 = vrot.slane %v1501_v27, 4  ;;  %v1514_v52 = vperm.slane %v1508_v38, %v4318_v13 }
 0x1d9   : > { %v1616_v48 = vsel %vm1481_vm0, 0, %v1615_v39  ;;  %v1641_v49 = vrot.slane %v1636_v41, 4  ;;  %v1644_v50 = vsel %vm1481_vm0, 0, %v1643_v42  ;;  %v1494_v58 = vsel %vm1481_vm0, 0, %v1493_v44 }
 0x1da   : > { %v1669_v53 = vrot.slane %v1644_v50, 4  ;;  %v1496_v54 = vsel %vm1481_vm0, 0, %v1495_v46  ;;  %v1510_v55 = vsel %vm1481_vm0, %v1506_v11, %v1509_v47  ;;  %v1651_v60 = vsel %vm1481_vm0, %v1650_v43, %v1616_v48 }
 0x1db   : > { %v1518_v56 = vperm.slane %v1510_v55, %v4318_v13  ;;  %v1528_v57 = vrot.slane %v1496_v54, 4  ;;  %v1642_v59 = vsel %vm1481_vm0, 0, %v1641_v49  ;;  %v1519_v61 = vrot.slane %v1514_v52, 4 }
 0x1dc   : > { %v1645_v0 = vsel %vm1481_vm0, %v1617_v33, %v1610_v32  ;;  %v1655_v1 = vperm.slane %v1651_v60, %v4312_v51  ;;  %v1664_v2 = vsel %vm1481_vm0, %v1643_v42, %v1636_v41  ;;  %v1670_v3 = vsel %vm1481_vm0, %v1669_v53, %v1642_v59 }
 0x1dd   : > { %v1521_v62 = vrot.slane %v1518_v56, 4  ;;  %v1529_v63 = vsel %vm1481_vm0, %v1528_v57, %v1494_v58  ;;  %v1674_v6 = vperm.slane %v1670_v3, %v4312_v51  ;;  %v1649_v8 = vperm.slane %v1645_v0, %v4312_v51  ;;  %v1698_v0 = vpop.permute.xlu0 %1697 }
 0x1de   : > { %v1533_v5 = vperm.slane %v1529_v63, %v4312_v51  ;;  %v1656_v9 = vrot.slane %v1655_v1, 4  ;;  %v1520_v10 = vsel %vm1481_vm0, 0, %v1519_v61  ;;  %v1668_v11 = vperm.slane %v1664_v2, %v4312_v51  ;;  %v1702_v61 = vpop.permute.xlu2 %1701  ;;  %v1700_v1 = vpop.permute.xlu1 %1699 }
 0x1df   : > { %v1522_v4 = vsel %vm1481_vm0, 0, %v1521_v62  ;;  %v1675_v12 = vrot.slane %v1674_v6, 4  ;;  %v1523_v14 = vsel %vm1481_vm0, %v1495_v46, %v1488_v31  ;;  %v1542_v15 = vsel %vm1481_vm0, %v1521_v62, %v1514_v52 }
 0x1e0   : > { %v1547_v7 = vrot.slane %v1522_v4, 4  ;;  %v1657_v17 = vsel %vm1481_vm0, %v1656_v9, %v1649_v8  ;;  %v1534_v18 = vrot.slane %v1533_v5, 4  ;;  %v1527_v24 = vperm.slane %v1523_v14, %v4312_v51 }
 0x1e1   : > { %v1661_v19 = vperm.slane %v1657_v17, %v4318_v13  ;;  %v1676_v21 = vsel %vm1481_vm0, %v1675_v12, %v1668_v11  ;;  %v1546_v25 = vperm.slane %v1542_v15, %v4312_v51  ;;  %v1706_v62 = vshrl.u32 %v4307_v45, 16 }
 0x1e2   : > { %v1548_v16 = vsel %vm1481_vm0, %v1547_v7, %v1520_v10  ;;  %v1680_v23 = vperm.slane %v1676_v21, %v4318_v13  ;;  %v1535_v33 = vsel %vm1481_vm0, %v1534_v18, %v1527_v24  ;;  %v1713_v63 = vshrl.u32 %v1702_v61, 16 }
 0x1e3   : > { %v1552_v22 = vperm.slane %v1548_v16, %v4312_v51  ;;  %v1662_v26 = vrot.slane %v1661_v19, 4  ;;  %v1686_v29 = vshrl.u32 %v1661_v19, 16  ;;  %v1539_v43 = vperm.slane %v1535_v33, %v4318_v13 }
 0x1e4   : > { %v1685_v28 = vpack.i.b16 %v1680_v23, %v1661_v19  ;;  %v1687_v30 = vshrl.u32 %v1680_v23, 16  ;;  %v1681_v31 = vrot.slane %v1680_v23, 4  ;;  %v1705_v2 = vpack.i.b16 %v1698_v0, %v4307_v45 }
 0x1e5   : > { %v1553_v27 = vrot.slane %v1552_v22, 4  ;;  %v1663_v32 = vsel %vm1481_vm0, 0, %v1662_v26  ;;  %v1564_v50 = vshrl.u32 %v1539_v43, 16  ;;  %v1540_v54 = vrot.slane %v1539_v43, 4 }
 0x1e6   : > { %v1822_v35 = vsel %vm1817_vm1, %v1685_v28, 0  ;;  %v1688_v36 = vpack.i.b16 %v1687_v30, %v1686_v29  ;;  %v1682_v37 = vsel %vm1481_vm0, 0, %v1681_v31  ;;  %v1692_v39 = vshrl.u32 %v1663_v32, 16 }
 0x1e7   : > { %v1554_v34 = vsel %vm1481_vm0, %v1553_v27, %v1546_v25  ;;  %1831 = vmatpush.bf16.xpose.msrb.mxu0 %v1822_v35  ;;  %v1691_v38 = vpack.i.b16 %v1682_v37, %v1663_v32  ;;  %v1693_v40 = vshrl.u32 %v1682_v37, 16  ;;  %v1541_v56 = vsel %vm1481_vm0, 0, %v1540_v54 }
 0x1e8   : > { %v1558_v41 = vperm.slane %v1554_v34, %v4318_v13  ;;  %v1841_v42 = vsel %vm1817_vm1, %v1688_v36, 0  ;;  %v1570_v58 = vshrl.u32 %v1541_v56, 16  ;;  %v1707_v3 = vshrl.u32 %v1698_v0, 16 }
 0x1e9   : > { %1850 = vmatpush.bf16.xpose.msra.mxu3 %v1841_v42  ;;  %v1860_v44 = vsel %vm1817_vm1, %v1691_v38, 0  ;;  %v1694_v46 = vpack.i.b16 %v1693_v40, %v1692_v39  ;;  %v1711_v4 = vpack.i.b16 %v1702_v61, %v1700_v1  ;;  %v1712_v5 = vshrl.u32 %v1700_v1, 16 }
 0x1ea   : > { %v1565_v47 = vshrl.u32 %v1558_v41, 16  ;;  %v1563_v49 = vpack.i.b16 %v1558_v41, %v1539_v43  ;;  %v1559_v53 = vrot.slane %v1558_v41, 4  ;;  %v1708_v6 = vpack.i.b16 %v1707_v3, %v1706_v62 }
 0x1eb   : > { %v1879_v48 = vsel %vm1817_vm1, %v1694_v46, 0  ;;  %v1719_v7 = vperm.slane %v1705_v2, %v4312_v51  ;;  %v1714_v8 = vpack.i.b16 %v1713_v63, %v1712_v5  ;;  %v1724_v9 = vperm.slane %v1711_v4, %v4312_v51 }
 0x1ec   : > { %v1566_v52 = vpack.i.b16 %v1565_v47, %v1564_v50  ;;  %v1560_v55 = vsel %vm1481_vm0, 0, %v1559_v53  ;;  %v1745_v11 = vperm.slane %v1708_v6, %v4312_v51 }
 0x1ed   : > { %v1571_v57 = vshrl.u32 %v1560_v55, 16  ;;  %v1569_v60 = vpack.i.b16 %v1560_v55, %v1541_v56  ;;  %v1727_v10 = vrot.slane %v1719_v7, 4  ;;  %v1725_v12 = vrot.slane %v1724_v9, 4 }
 0x1ee   : > { %2983 = vmatmul.msk.bf16.vlgmr.msrb.gmra.mxu0 %vm1817_vm1, %v1563_v49  ;;  %v1750_v14 = vperm.slane %v1714_v8, %v4312_v51  ;;  %v1753_v15 = vrot.slane %v1745_v11, 4 }
 0x1ef   : > { %1888 = vmatpush.bf16.xpose.msra.mxu0 %v1879_v48  ;;  %v1572_v59 = vpack.i.b16 %v1571_v57, %v1570_v58  ;;  %v1726_v16 = vsel %vm1481_vm0, %v1725_v12, %v1719_v7  ;;  %v1728_v45 = vsel %vm1481_vm0, %v1724_v9, %v1727_v10 }
 0x1f0   : > { %2984 = vmatmul.msk.bf16.vlgmr.msra.gmra.mxu3 %vm1817_vm1, %v1566_v52  ;;  %v1751_v17 = vrot.slane %v1750_v14, 4  ;;  %v1732_v18 = vperm.slane %v1726_v16, %v4318_v13  ;;  %v1736_v19 = vperm.slane %v1728_v45, %v4318_v13  ;;  %v1754_v22 = vsel %vm1481_vm0, %v1750_v14, %v1753_v15 }
 0x1f1   : > { %1869 = vmatpush.bf16.xpose.msrb.mxu3 %v1860_v44  ;;  %v1762_v25 = vperm.slane %v1754_v22, %v4318_v13 }
 0x1f2   : > { %v1752_v21 = vsel %vm1481_vm0, %v1751_v17, %v1745_v11  ;;  %v1739_v23 = vrot.slane %v1736_v19, 4  ;;  %v1737_v26 = vrot.slane %v1732_v18, 4 }
 0x1f3   : > { %v1758_v24 = vperm.slane %v1752_v21, %v4318_v13  ;;  %v1765_v28 = vrot.slane %v1762_v25, 4 }
 0x1f4   : > { %v1740_v27 = vsel %vm1481_vm0, 0, %v1739_v23  ;;  %v1738_v33 = vsel %vm1481_vm0, 0, %v1737_v26  ;;  %v1767_v39 = vsel %vm1481_vm0, %v1739_v23, %v1732_v18 }
 0x1f5   : > { %v1763_v29 = vrot.slane %v1758_v24, 4  ;;  %v1766_v30 = vsel %vm1481_vm0, 0, %v1765_v28  ;;  %v1772_v31 = vrot.slane %v1740_v27, 4  ;;  %v1786_v40 = vsel %vm1481_vm0, %v1765_v28, %v1758_v24 }
 0x1f6   : > { %v1791_v32 = vrot.slane %v1766_v30, 4  ;;  %v1771_v41 = vperm.slane %v1767_v39, %v4312_v51  ;;  %v1790_v43 = vperm.slane %v1786_v40, %v4312_v51 }
 0x1f7   : > { %v1764_v34 = vsel %vm1481_vm0, 0, %v1763_v29  ;;  %v1773_v35 = vsel %vm1481_vm0, %v1772_v31, %v1738_v33 }
 0x1f8   : > { %v1792_v36 = vsel %vm1481_vm0, %v1791_v32, %v1764_v34  ;;  %v1777_v37 = vperm.slane %v1773_v35, %v4312_v51 }
 0x1f9   : > { %v1796_v38 = vperm.slane %v1792_v36, %v4312_v51 }
 0x1fa   : > { %v1778_v42 = vrot.slane %v1777_v37, 4 }
 0x1fb   : > { %v1797_v44 = vrot.slane %v1796_v38, 4 }
 0x1fc   : > { %v1779_v46 = vsel %vm1481_vm0, %v1778_v42, %v1771_v41 }
 0x1fd   : > { %v1798_v47 = vsel %vm1481_vm0, %v1797_v44, %v1790_v43  ;;  %v1783_v48 = vperm.slane %v1779_v46, %v4318_v13 }
 0x1fe   : > { %2986 = vmatmul.msk.bf16.vlgmr.msra.gmra.mxu0 %vm1817_vm1, %v1572_v59  ;;  %v1802_v49 = vperm.slane %v1798_v47, %v4318_v13 }
 0x1ff   : > { %v1808_v52 = vshrl.u32 %v1783_v48, 16  ;;  %v1784_v54 = vrot.slane %v1783_v48, 4 }
 0x200   : > { %2985 = vmatmul.msk.bf16.vlgmr.msrb.gmra.mxu3 %vm1817_vm1, %v1569_v60  ;;  %v1807_v50 = vpack.i.b16 %v1802_v49, %v1783_v48  ;;  %v1809_v53 = vshrl.u32 %v1802_v49, 16  ;;  %v1803_v55 = vrot.slane %v1802_v49, 4 }
 0x201   : > { %v1785_v58 = vsel %vm1481_vm0, 0, %v1784_v54 }
 0x202   : > { %v1967_v56 = vsel %vm1965_vm2, %v1807_v50, 0  ;;  %v1810_v57 = vpack.i.b16 %v1809_v53, %v1808_v52  ;;  %v1804_v59 = vsel %vm1481_vm0, 0, %v1803_v55  ;;  %v1814_v60 = vshrl.u32 %v1785_v58, 16 }
 0x203   : > { %1976 = vmatpush.bf16.msrb.mxu1 %v1967_v56  ;;  %v1813_v62 = vpack.i.b16 %v1804_v59, %v1785_v58  ;;  %v1815_v63 = vshrl.u32 %v1804_v59, 16 }
 0x204   : > { %v1986_v61 = vsel %vm1965_vm2, %v1810_v57, 0 }
 0x205   : > { %1995 = vmatpush.bf16.msrb.mxu2 %v1986_v61  ;;  %v2005_v0 = vsel %vm1965_vm2, %v1813_v62, 0  ;;  %v1816_v1 = vpack.i.b16 %v1815_v63, %v1814_v60 }
 0x206   : > { %2014 = vmatpush.bf16.msra.mxu3 %v2005_v0 }
 0x207   : > { %v2024_v2 = vsel %vm1965_vm2, %v1816_v1, 0 }
 0x208   : > { %2033 = vmatpush.bf16.msrb.mxu0 %v2024_v2 }
 0x26b   : > { %v1833_v3 = vpop.f32.mrf.mxu0 }
 0x26c   : > { %v1894_v4 = vmul.f32 0.35355338, %v1833_v3 }
 0x26e   : > { %v1898_v5 = vsel %vm1817_vm1, %v1894_v4, -inf }
 0x26f   : > { %1899 = vmax.xlane.f32.xlu2 %v1898_v5 }
 0x273   : > { %v1835_v6 = vpop.f32.mrf.mxu0  ;;  %v1852_v7 = vpop.f32.mrf.mxu3 }
 0x274   : > { %v1895_v8 = vmul.f32 0.35355338, %v1852_v7 }
 0x276   : > { %v1901_v9 = vsel %vm1817_vm1, %v1895_v8, -inf }
 0x277   : > { %1902 = vmax.xlane.f32.xlu1 %v1901_v9 }
 0x27b   : > { %v1854_v10 = vpop.f32.mrf.mxu3  ;;  %v1890_v11 = vpop.f32.mrf.mxu0 }
 0x27c   : > { %v1897_v12 = vmul.f32 0.35355338, %v1890_v11 }
 0x27e   : > { %v1907_v14 = vsel %vm1817_vm1, %v1897_v12, -inf }
 0x27f   : > { %1908 = vmax.xlane.f32.xlu2 %v1907_v14 }
 0x283   : > { %v1871_v15 = vpop.f32.mrf.mxu3  ;;  %v1892_v16 = vpop.f32.mrf.mxu0 }
 0x284   : > { %v1896_v45 = vmul.f32 0.35355338, %v1871_v15 }
 0x286   : > { %v1904_v17 = vsel %vm1817_vm1, %v1896_v45, -inf }
 0x287   : > { %1905 = vmax.xlane.f32.xlu0 %v1904_v17 }
 0x28b   : > { %v1873_v18 = vpop.f32.mrf.mxu3 }
 0x2e2   : > { %v1900_v19 = vpop.xlane.xlu2 %1899 }
 0x2e3   : > { %v1910_v21 = vmax.f32 %v1900_v19, -1e+30 }
 0x2e5   : > { %v1926_v22 = vsub.f32 %v1894_v4, %v1910_v21  ;;  %v1914_v50 = vsub.f32 -1e+30, %v1910_v21 }
 0x2e7   : > { %v1930_v23 = vmul.f32 1.442695, %v1926_v22  ;;  %v1918_v55 = vmul.f32 1.442695, %v1914_v50 }
 0x2e9   : > { %3254 = vpow2.f32 %v1930_v23 }
 0x2ea   : > { %v1903_v24 = vpop.xlane.xlu1 %1902 }
 0x2eb   : > { %v1911_v25 = vmax.f32 %v1903_v24, -1e+30 }
 0x2ed   : > { %v1927_v26 = vsub.f32 %v1895_v8, %v1911_v25  ;;  %v1915_v54 = vsub.f32 -1e+30, %v1911_v25 }
 0x2ef   : > { %v1932_v27 = vmul.f32 1.442695, %v1927_v26  ;;  %v3255_v28 = vpop.eup %3254  ;;  %v1920_v57 = vmul.f32 1.442695, %v1915_v54 }
 0x2f0   : > { %v1942_v29 = vsel %vm1817_vm1, %v3255_v28, 0.0  ;;  %v1958_v30 = vpack.c.bf16 %v3255_v28, %v3255_v28 }
 0x2f1   : > { %3256 = vpow2.f32 %v1932_v27  ;;  %1943 = vadd.xlane.f32.xlu1 %v1942_v29 }
 0x2f2   : > { %v1909_v31 = vpop.xlane.xlu2 %1908  ;;  %2987 = vmatmul.msk.bf16.vlgmr.msrb.gmra.mxu1 %vm1817_vm1, %v1958_v30 }
 0x2f3   : > { %v1913_v32 = vmax.f32 %v1909_v31, -1e+30 }
 0x2f5   : > { %v1929_v33 = vsub.f32 %v1897_v12, %v1913_v32  ;;  %v1917_v49 = vsub.f32 -1e+30, %v1913_v32 }
 0x2f7   : > { %v1936_v34 = vmul.f32 1.442695, %v1929_v33  ;;  %v3257_v35 = vpop.eup %3256  ;;  %v1924_v53 = vmul.f32 1.442695, %v1917_v49 }
 0x2f8   : > { %v1959_v36 = vpack.c.bf16 %v3257_v35, %v3257_v35  ;;  %v1945_v48 = vsel %vm1817_vm1, %v3257_v35, 0.0 }
 0x2f9   : > { %3258 = vpow2.f32 %v1936_v34 }
 0x2fa   : > { %v1906_v37 = vpop.xlane.xlu0 %1905  ;;  %2988 = vmatmul.msk.bf16.vlgmr.msrb.gmra.mxu2 %vm1817_vm1, %v1959_v36 }
 0x2fb   : > { %v1912_v38 = vmax.f32 %v1906_v37, -1e+30 }
 0x2fd   : > { %v1928_v39 = vsub.f32 %v1896_v45, %v1912_v38  ;;  %v1916_v56 = vsub.f32 -1e+30, %v1912_v38 }
 0x2ff   : > { %v1934_v40 = vmul.f32 1.442695, %v1928_v39  ;;  %v3259_v41 = vpop.eup %3258  ;;  %v1922_v58 = vmul.f32 1.442695, %v1916_v56 }
 0x300   : > { %v1961_v42 = vpack.c.bf16 %v3259_v41, %v3259_v41  ;;  %v1951_v43 = vsel %vm1817_vm1, %v3259_v41, 0.0 }
 0x301   : > { %3260 = vpow2.f32 %v1934_v40  ;;  %1952 = vadd.xlane.f32.xlu2 %v1951_v43 }
 0x302   : > { %2990 = vmatmul.msk.bf16.vlgmr.msrb.gmra.mxu0 %vm1817_vm1, %v1961_v42  ;;  %3262 = vpow2.f32 %v1924_v53 }
 0x303   : > { %3264 = vpow2.f32 %v1918_v55 }
 0x304   : > { %3266 = vpow2.f32 %v1920_v57 }
 0x305   : > { %3268 = vpow2.f32 %v1922_v58 }
 0x307   : > { %v3261_v44 = vpop.eup %3260 }
 0x308   : > { %v1960_v46 = vpack.c.bf16 %v3261_v44, %v3261_v44  ;;  %v1948_v47 = vsel %vm1817_vm1, %v3261_v44, 0.0  ;;  %v3263_v60 = vpop.eup %3262 }
 0x309   : > { %1949 = vadd.xlane.f32.xlu0 %v1948_v47  ;;  %v3265_v61 = vpop.eup %3264  ;;  %v1941_v0 = vmul.f32 0.0, %v3263_v60 }
 0x30a   : > { %2989 = vmatmul.msk.bf16.vlgmr.msra.gmra.mxu3 %vm1817_vm1, %v1960_v46  ;;  %v3267_v3 = vpop.eup %3266  ;;  %v1938_v4 = vmul.f32 0.0, %v3265_v61 }
 0x30b   : > { %v3269_v7 = vpop.eup %3268  ;;  %v1939_v10 = vmul.f32 0.0, %v3267_v3 }
 0x30c   : > { %v1940_v9 = vmul.f32 0.0, %v3269_v7 }
 0x311   : > { %1946 = vadd.xlane.f32.xlu0 %v1945_v48 }
 0x364   : > { %v1944_v2 = vpop.xlane.xlu1 %1943 }
 0x365   : > { %v1954_v8 = vadd.f32 %v1944_v2, %v1938_v4 }
 0x36f   : > { %v1978_v52 = vpop.f32.mrf.mxu1 }
 0x370   : > { %v2039_v17 = vadd.f32 %v1978_v52, %v1938_v4 }
 0x374   : > { %v1953_v62 = vpop.xlane.xlu2 %1952 }
 0x375   : > { %v1957_v5 = vadd.f32 %v1953_v62, %v1941_v0 }
 0x377   : > { %v1980_v59 = vpop.f32.mrf.mxu1  ;;  %3270 = vrcp.f32 %v1957_v5 }
 0x378   : > { %3272 = vrcp.f32 %v1954_v8 }
 0x37c   : > { %v1950_v63 = vpop.xlane.xlu0 %1949 }
 0x37d   : > { %v1997_v1 = vpop.f32.mrf.mxu2  ;;  %v1956_v12 = vadd.f32 %v1950_v63, %v1940_v9  ;;  %v3271_v18 = vpop.eup %3270 }
 0x37e   : > { %v3273_v21 = vpop.eup %3272  ;;  %v2040_v23 = vadd.f32 %v1997_v1, %v1939_v10 }
 0x37f   : > { %v2035_v6 = vpop.f32.mrf.mxu0  ;;  %v2047_v22 = vmul.f32 %v3273_v21, %v2039_v17 }
 0x380   : > { %v2042_v16 = vadd.f32 %v2035_v6, %v1941_v0 }
 0x381   : > { %v2054_v30 = vrot.slane %v2047_v22, 4 }
 0x382   : > { %v2050_v19 = vmul.f32 %v3271_v18, %v2042_v16 }
 0x384   : > { %v1947_v11 = vpop.xlane.xlu0 %1946  ;;  %v2064_v26 = vrot.slane %v2050_v19, 4 }
 0x385   : > { %v1955_v14 = vadd.f32 %v1947_v11, %v1939_v10  ;;  %v1999_v15 = vpop.f32.mrf.mxu2 }
 0x387   : > { %3274 = vrcp.f32 %v1955_v14  ;;  %v2037_v45 = vpop.f32.mrf.mxu0 }
 0x388   : > { %3276 = vrcp.f32 %v1956_v12 }
 0x38d   : > { %v3275_v24 = vpop.eup %3274  ;;  %v2016_v25 = vpop.f32.mrf.mxu3 }
 0x38e   : > { %v2048_v27 = vmul.f32 %v3275_v24, %v2040_v23  ;;  %v2041_v28 = vadd.f32 %v2016_v25, %v1940_v9  ;;  %v3277_v29 = vpop.eup %3276 }
 0x390   : > { %v2065_v31 = vsel %vm1481_vm0, %v2064_v26, %v2048_v27  ;;  %v2066_v32 = vrot.slane %v2048_v27, 4  ;;  %v2049_v33 = vmul.f32 %v3277_v29, %v2041_v28 }
 0x391   : > { %v2071_v34 = vperm.slane %v2065_v31, %v4312_v51  ;;  %v3099_v31 = vld [vmem:[%s4735_s18 + $0x8] sm:$0xff] }
 0x392   : > { %v2067_v35 = vsel %vm1481_vm0, %v2050_v19, %v2066_v32  ;;  %v2051_v36 = vrot.slane %v2049_v33, 4  ;;  %v2055_v37 = vsel %vm1481_vm0, %v2049_v33, %v2054_v30  ;;  %2210 = vmatpush.bf16.msra.mxu1 %v3099_v31 }
 0x393   : > { %v2075_v38 = vperm.slane %v2067_v35, %v4312_v51  ;;  %v2063_v39 = vperm.slane %v2055_v37, %v4312_v51  ;;  %v2076_v41 = vrot.slane %v2071_v34, 4 }
 0x394   : > { %v2053_v40 = vsel %vm1481_vm0, %v2051_v36, %v2047_v22 }
 0x395   : > { %v2059_v42 = vperm.slane %v2053_v40, %v4312_v51  ;;  %v2088_v43 = vrot.slane %v2075_v38, 4  ;;  %v2090_v44 = vrot.slane %v2063_v39, 4  ;;  %v2018_v46 = vpop.f32.mrf.mxu3 }
 0x396   : > { %v1197_v46 = vlaneseq }
 0x397   : > { %v2077_v47 = vsel %vm1481_vm0, %v2076_v41, %v2059_v42  ;;  %v2078_v48 = vrot.slane %v2059_v42, 4  ;;  %v2089_v49 = vsel %vm1481_vm0, %v2088_v43, %v2063_v39  ;;  %v2091_v50 = vsel %vm1481_vm0, %v2075_v38, %v2090_v44  ;;  %v3247_v39 = vld [vmem:[%s4739_s20] ss:$0 sm:$0xff]  ;;  %v3107_v44 = vld [vmem:[%s4737_s2 + $0x38] sm:$0xff] }
 0x398   : > { %v2083_v52 = vperm.slane %v2077_v47, %v4318_v13  ;;  %v2095_v53 = vperm.slane %v2089_v49, %v4318_v13  ;;  %v2099_v54 = vperm.slane %v2091_v50, %v4318_v13  ;;  %2318 = vmatpush.bf16.msra.mxu2 %v3107_v44  ;;  %v1198_v47 = vand.u32 127, %v1197_v46 }
 0x399   : > { %v2079_v55 = vsel %vm1481_vm0, %v2071_v34, %v2078_v48  ;;  %v3748_v50 = vmov 0.0  }
 0x39a   : > { %v2087_v56 = vperm.slane %v2079_v55, %v4318_v13  ;;  %v2104_v57 = vrot.slane %v2095_v53, 4  ;;  %v2106_v58 = vrot.slane %v2099_v54, 4  ;;  %v2100_v61 = vrot.slane %v2083_v52, 4  ;;  %v3106_v55 = vld [vmem:[%s4737_s2 + $0x30] sm:$0xff] }
 0x39b   : > { %vm1199_vm6 = vcmp.lt.s32.totalorder %v1198_v47, 32  ;;  %v3252_v47 = vld [vmem:[%s4251_s16] ss:$0 sm:$0xff] }
 0x39c   : > { %v2102_v59 = vrot.slane %v2087_v56, 4  ;;  %v2107_v60 = vsel %vm1481_vm0, 0.0, %v2106_v58  ;;  %v2119_v63 = vsel %vm1481_vm0, %v2106_v58, %v2095_v53  ;;  %v2105_v1 = vsel %vm1481_vm0, 0.0, %v2104_v57  ;;  %2319 = vmatpush.bf16.msra.mxu2 %v3106_v55  ;;  %v3105_v56 = vld [vmem:[%s4737_s2 + $0x28] sm:$0xff]  ;;  %v3104_v57 = vld [vmem:[%s4737_s2 + $0x20] sm:$0xff]  ;;  %v3103_v58 = vld [vmem:[%s4737_s2 + $0x18] sm:$0xff] }
 0x39d   : > { %v2124_v62 = vrot.slane %v2107_v60, 4  ;;  %v2123_v3 = vperm.slane %v2119_v63, %v4312_v51  ;;  %v2101_v7 = vsel %vm1481_vm0, 0.0, %v2100_v61  ;;  %v3101_v60 = vld [vmem:[%s4737_s2 + $0x8] sm:$0xff]  ;;  %v3100_v61 = vld [vmem:[%s4737_s2] sm:$0xff] }
 0x39e   : > { %v2103_v0 = vsel %vm1481_vm0, 0.0, %v2102_v59  ;;  %v2108_v2 = vsel %vm1481_vm0, %v2102_v59, %v2083_v52  ;;  %v4484_v52 = vsel %vm1199_vm6, 1.0, %v3748_v50  ;;  %v3102_v59 = vld [vmem:[%s4737_s2 + $0x10] sm:$0xff]  ;;  %v3253_v50 = vld [vmem:[%s1188_s28] ss:$0 sm:$0xff] }
 0x39f   : > { %v2112_v4 = vperm.slane %v2108_v2, %v4312_v51  ;;  %v2113_v5 = vrot.slane %v2103_v0, 4  ;;  %v2125_v6 = vsel %vm1481_vm0, %v2124_v62, %v2105_v1  ;;  %v2144_v9 = vrot.slane %v2123_v3, 4  ;;  %v3115_v62 = vld [vmem:[%s4740_s5 + $0x38] sm:$0xff]  ;;  %v3114_v1 = vld [vmem:[%s4740_s5 + $0x30] sm:$0xff] }
 0x3a0   : > { %v2129_v8 = vperm.slane %v2125_v6, %v4312_v51  ;;  %2320 = vmatpush.bf16.msra.mxu2 %v3105_v56  ;;  %2401 = vmatpush.bf16.msrb.mxu3 %v3115_v62 }
 0x3a1   : > { %v2114_v10 = vsel %vm1481_vm0, %v2113_v5, %v2101_v7  ;;  %v2132_v11 = vrot.slane %v2112_v4, 4  ;;  %v3111_v7 = vld [vmem:[%s4740_s5 + $0x18] sm:$0xff] }
 0x3a2   : > { %v2118_v12 = vperm.slane %v2114_v10, %v4312_v51  ;;  %v2145_v14 = vsel %vm1481_vm0, %v2129_v8, %v2144_v9  ;;  %v2142_v15 = vrot.slane %v2129_v8, 4  ;;  %v3110_v10 = vld [vmem:[%s4740_s5 + $0x10] sm:$0xff] }
 0x3a3   : > { %v2153_v16 = vperm.slane %v2145_v14, %v4318_v13  ;;  %v3248_v14 = vld [vmem:[%s1182_s3] ss:$0 sm:$0xff] }
 0x3a4   : > { %v2133_v45 = vsel %vm1481_vm0, %v2118_v12, %v2132_v11  ;;  %v2130_v17 = vrot.slane %v2118_v12, 4  ;;  %v2143_v18 = vsel %vm1481_vm0, %v2142_v15, %v2123_v3  ;;  %2321 = vmatpush.bf16.msra.mxu2 %v3104_v57  ;;  %2402 = vmatpush.bf16.msrb.mxu3 %v3114_v1  ;;  %v3113_v3 = vld [vmem:[%s4740_s5 + $0x28] sm:$0xff] }
 0x3a5   : > { %v2141_v19 = vperm.slane %v2133_v45, %v4318_v13  ;;  %v2158_v21 = vrot.slane %v2153_v16, 4  ;;  %v2149_v22 = vperm.slane %v2143_v18, %v4318_v13  ;;  %v3249_v45 = vld [vmem:[%s1185_s8] ss:$0 sm:$0xff] }
 0x3a6   : > { %v2131_v23 = vsel %vm1481_vm0, %v2130_v17, %v2112_v4  ;;  %v3112_v4 = vld [vmem:[%s4740_s5 + $0x20] sm:$0xff] }
 0x3a7   : > { %v2159_v51 = vsel %vm1481_vm0, %v2158_v21, %v2141_v19  ;;  %v2160_v24 = vrot.slane %v2141_v19, 4  ;;  %v2137_v25 = vperm.slane %v2131_v23, %v4318_v13  ;;  %v2154_v26 = vrot.slane %v2149_v22, 4  ;;  %v3098_v13 = vld [vmem:[%s4736_s22] sm:$0xff]  ;;  %v3109_v21 = vld [vmem:[%s4740_s5 + $0x8] sm:$0xff] }
 0x3a8   : > { %2167 = vrot.lane.b32.xlu2 %v2159_v51, %s3745_s15  ;;  %2211 = vmatpush.bf16.msra.mxu1 %v3098_v13  ;;  %v3250_v23 = vld [vmem:[%s1176_s4] ss:$0 sm:$0xff]  ;;  %s3065_s4 = sshll.u32 %s4745_s30, 3 }
 0x3a9   : > { %v2161_v27 = vsel %vm1481_vm0, %v2153_v16, %v2160_v24  ;;  %v2156_v28 = vrot.slane %v2137_v25, 4  ;;  %v2155_v29 = vsel %vm1481_vm0, %v2154_v26, %v2137_v25  ;;  %2322 = vmatpush.bf16.msra.mxu2 %v3103_v58  ;;  %2403 = vmatpush.bf16.msrb.mxu3 %v3113_v3 }
 0x3aa   : > { %2171 = vrot.lane.b32.xlu0 %v2161_v27, %s3746_s11  ;;  %s4747_s11 = sld [smem:[#allocation70_spill]] }
 0x3ab   : > { %v2157_v30 = vsel %vm1481_vm0, %v2149_v22, %v2156_v28  ;;  %v3108_v22 = vld [vmem:[%s4740_s5] sm:$0xff] }
 0x3ac   : > { %2163 = vrot.lane.b32.xlu1 %v2157_v30, %s3747_s9  ;;  %v3251_v28 = vld [vmem:[%s1179_s24] ss:$0 sm:$0xff]  ;;  %s4746_s24 = sld [smem:[#allocation46_spill]] }
 0x3ad   : > { %2323 = vmatpush.bf16.msra.mxu2 %v3102_v59  ;;  %2404 = vmatpush.bf16.msrb.mxu3 %v3112_v4 }
 0x3b0   : > { %s2459_s9 = scalar_lea.hbm %s4747_s11, %s3065_s4  ;;  %s3610_s10 = scalar_lea.hbm %s4747_s11, 16 }
 0x3b1   : > { %2324 = vmatpush.bf16.msra.mxu2 %v3101_v60  ;;  %2405 = vmatpush.bf16.msrb.mxu3 %v3111_v7  ;;  %s2463_s25 = sshll.u32 %s2459_s9, 4  ;;  %s2464_s25 = int_to_ptr.hbm [resolvable:$true] %s2463_s25 }
 0x3b2   : > { %s2448_s16 = scalar_lea.sflag [#allocation4], %s4746_s24  ;;  %s3604_s20 = sshra.s32 %s2464_s25, 4  ;;  %s3605_s20 = int_to_ptr.hbm [resolvable:$true] %s3604_s20 }
 0x3b3   : > { %s3606_s5 = scalar_lea.hbm %s3605_s20, 8  ;;  %p3611_p0 = scmp.lt.s32.totalorder %s3605_s20, %s4747_s11 }
 0x3b4   : > { %p3607_p11 = scmp.ne.s32.totalorder %s3605_s20, %s3606_s5  ;;  %p3612_p5 = scmp.lt.s32.totalorder %s3610_s10, %s3606_s5 }
 0x3b5   : > { %2325 = vmatpush.bf16.msra.mxu2 %v3100_v61  ;;  %2406 = vmatpush.bf16.msrb.mxu3 %v3110_v10 }
 0x3b6   : > { %p3608_p12 = pnand %p3607_p11, %p3976_p4  ;;  %p3613_p8 = por %p3612_p5, %p3611_p0 }
 0x3b8   : > { %p3609_p13 = pneg %p3608_p12 }
 0x3b9   : > { %2407 = vmatpush.bf16.msrb.mxu3 %v3109_v21 }
 0x3ba   : > { %p3614_p2 = pnand %p3613_p8, %p3609_p13 }
 0x3bd   : > { %2408 = vmatpush.bf16.msrb.mxu3 %v3108_v22 }
 0x402   : > { %v2168_v33 = vpop.permute.xlu2 %2167 }
 0x41c   : > { %v2172_v35 = vpop.permute.xlu0 %2171 }
 0x41e   : > { %v2164_v32 = vpop.permute.xlu1 %2163 }
 0x41f   : > { %v2174_v34 = vsel %vm1817_vm1, %v2155_v29, %v2164_v32 }
 0x420   : > { %v2176_v36 = vsel %vm2175_vm3, %v2174_v34, %v2168_v33 }
 0x421   : > { %v2178_v37 = vsel %vm2177_vm4, %v2176_v36, %v2172_v35 }
 0x422   : > { %v2183_v38 = vpack.c.bf16 %v2178_v37, %v2178_v37 }
 0x424   : > { %2999 = vmatmul.msk.bf16.vlgmr.msra.gmra.mxu1 %vm2200_vm5, %v2183_v38 }
 0x4a1   : > { %v2213_v40 = vpop.f32.mrf.mxu1 }
 0x4a2   : > { %v2214_v41 = vadd.f32 %v3247_v39, %v2213_v40 }
 0x4a4   : > { %v2217_v42 = vadd.f32 %v2214_v41, %v4280_v20 }
 0x4a6   : > { %2220 = vadd.xlane.f32.xlu1 %v2217_v42 }
 0x4a9   : > { %v2215_v43 = vpop.f32.mrf.mxu1 }
 0x519   : > { %v2221_v48 = vpop.xlane.xlu1 %2220 }
 0x51a   : > { %v2222_v49 = vmul.f32 0.03125, %v2221_v48 }
 0x51c   : > { %v2223_v53 = vsub.f32 %v2217_v42, %v2222_v49 }
 0x51e   : > { %v2224_v20 = vmul.f32 %v4484_v52, %v2223_v53 }
 0x520   : > { %v2225_v54 = vmul.f32 %v2224_v20, %v2224_v20 }
 0x522   : > { %2226 = vadd.xlane.f32.xlu0 %v2225_v54 }
 0x595   : > { %v2227_v63 = vpop.xlane.xlu0 %2226 }
 0x596   : > { %v2228_v0 = vmul.f32 0.03125, %v2227_v63 }
 0x598   : > { %v2229_v2 = vadd.f32 1e-05, %v2228_v0 }
 0x59a   : > { %3278 = vrsqrt.f32 %v2229_v2  ;;  %vm2236_vm8 = vweird.f32 %v2229_v2 }
 0x5a0   : > { %v3279_v5 = vpop.eup %3278 }
 0x5a1   : > { %v2231_v6 = vmul.f32 %v3279_v5, %v2229_v2  ;;  %vm2237_vm7 = vweird.f32 %v3279_v5 }
 0x5a2   : > { %vm2238_vm9 = vmor %vm2236_vm8, %vm2237_vm7 }
 0x5a3   : > { %v2232_v8 = vmul.f32 %v3279_v5, %v2231_v6 }
 0x5a5   : > { %v2233_v9 = vmul.f32 0.5, %v2232_v8 }
 0x5a7   : > { %v2234_v11 = vsub.f32 1.5, %v2233_v9 }
 0x5a9   : > { %v2235_v12 = vmul.f32 %v3279_v5, %v2234_v11 }
 0x5ab   : > { %v2239_v15 = vsel %vm2238_vm9, %v3279_v5, %v2235_v12 }
 0x5ac   : > { %v2240_v16 = vmul.f32 %v2239_v15, %v2224_v20 }
 0x5ae   : > { %v2244_v17 = vmul.f32 %v3248_v14, %v2240_v16 }
 0x5b0   : > { %v2248_v18 = vadd.f32 %v3249_v45, %v2244_v17 }
 0x5b2   : > { %v2249_v19 = vpack.c.bf16 %v2248_v18, %v2248_v18 }
 0x5b4   : > { %2326 = vmatmul.bf16.vlgmr.msra.gmra.mxu2 %v2249_v19 }
 0x637   : > { %v2327_v51 = vpop.f32.mrf.mxu2 }
 0x638   : > { %v2328_v24 = vadd.f32 %v3250_v23, %v2327_v51 }
 0x63a   : > { %v2331_v25 = vmax.f32 %v2328_v24, 0.0 }
 0x63c   : > { %v2332_v26 = vpack.c.bf16 %v2331_v25, %v2331_v25 }
 0x63e   : > { %2409 = vmatmul.bf16.vlgmr.msrb.gmra.mxu3 %v2332_v26 }
 0x63f   : > { %v2329_v27 = vpop.f32.mrf.mxu2 }
 0x6c1   : > { %v2410_v29 = vpop.f32.mrf.mxu3 }
 0x6c2   : > { %v2411_v30 = vadd.f32 %v3251_v28, %v2410_v29 }
 0x6c4   : > { %v2414_v31 = vadd.f32 %v2411_v30, %v2248_v18 }
 0x6c6   : > { %2417 = vadd.xlane.f32.xlu2 %v2414_v31 }
 0x6c9   : > { %v2412_v13 = vpop.f32.mrf.mxu3 }
 0x739   : > { %v2418_v32 = vpop.xlane.xlu2 %2417 }
 0x73a   : > { %v2419_v33 = vmul.f32 0.03125, %v2418_v32 }
 0x73c   : > { %v2420_v34 = vsub.f32 %v2414_v31, %v2419_v33 }
 0x73e   : > { %v2421_v35 = vmul.f32 %v4484_v52, %v2420_v34 }
 0x740   : > { %v2422_v36 = vmul.f32 %v2421_v35, %v2421_v35 }
 0x742   : > { %2423 = vadd.xlane.f32.xlu1 %v2422_v36 }
 0x7b5   : > { %v2424_v37 = vpop.xlane.xlu1 %2423 }
 0x7b6   : > { %v2425_v38 = vmul.f32 0.03125, %v2424_v37 }
 0x7b8   : > { %v2426_v39 = vadd.f32 1e-05, %v2425_v38 }
 0x7ba   : > { %3280 = vrsqrt.f32 %v2426_v39  ;;  %vm2433_vm11 = vweird.f32 %v2426_v39 }
 0x7c0   : > { %v3281_v40 = vpop.eup %3280 }
 0x7c1   : > { %v2428_v41 = vmul.f32 %v3281_v40, %v2426_v39  ;;  %vm2434_vm10 = vweird.f32 %v3281_v40 }
 0x7c2   : > { %vm2435_vm12 = vmor %vm2433_vm11, %vm2434_vm10 }
 0x7c3   : > { %v2429_v42 = vmul.f32 %v3281_v40, %v2428_v41 }
 0x7c5   : > { %v2430_v43 = vmul.f32 0.5, %v2429_v42 }
 0x7c7   : > { %v2431_v44 = vsub.f32 1.5, %v2430_v43 }
 0x7c9   : > { %v2432_v46 = vmul.f32 %v3281_v40, %v2431_v44 }
 0x7cb   : > { %v2436_v48 = vsel %vm2435_vm12, %v3281_v40, %v2432_v46 }
 0x7cc   : > { %v2437_v49 = vmul.f32 %v2436_v48, %v2421_v35 }
 0x7ce   : > { %v2441_v52 = vmul.f32 %v3252_v47, %v2437_v49 }
 0x7d0   : > { %v2445_v53 = vadd.f32 %v3253_v50, %v2441_v52 }
 0x7d2   : > { %2446 = vst [vmem:[%s4254_s23] sm:$0xff] %v2445_v53 }
 0x7d3   : > { %3617 = shalt.err (!%p3614_p2)
}
 0x7d4   : > { %3138 = dma.vmem_to_hbm [thread:$0]  (%p3976_p4), %s2462_s27, 128, %s2464_s25, %s2448_s16  }
 0x7d5 PF: > { %s4750_s23 = sld [smem:[#allocation38_spill]] }
 0x7d6   : > { %s4751_s0 = sld [smem:[#allocation31_spill]] }
 0x7db   : > { %p3144_p1 = scmp.ge.s32.totalorder %s4750_s23, 2 }
 0x7dc   : > { %s2475_s17 = sand.u32 1, %s4751_s0  }
 0x7dd   : > { %p3141_p3 = pnand %p3144_p1, %p3983_p10  ;;  %s2476_s7 = scalar_lea.sflag [#allocation4], %s2475_s17 }
 0x7df   : > { %p3142_p6 = pneg %p3141_p3 }
 0x7e1   : > { %3691 = dma.done.wait (%p3142_p6), %s2476_s7, 128  }
 0x7e2   : > { %3693 = vsyncadd (%p3142_p6), %s2476_s7, 4294967168  ;;  %s51_s4 = sadd.s32 1, %s4750_s23   ;;  %s4753_s1 = sld [smem:[#allocation29_spill]] }
 0x7e3   : > { %p48_p7 = scmp.ge.s32.totalorder %s51_s4, 6   ;;  %s4754_s22 = sld [smem:[#allocation30_spill]] }
 0x7e4   : > { %s4755_s23 = sld [smem:[#allocation41_spill]] }
 0x7e5   : > { %s4756_s24 = sld [smem:[#allocation32_spill]] }
 0x7e6   : > { %s4757_s2 = sld [smem:[#allocation33_spill]] }
 0x7e7   : > { %s4758_s25 = sld [smem:[#allocation42_spill]]  ;;  %50 = sbr.rel (!%p48_p7) target bundleno = 41 (0x29), region = 296 }
 0x7e8   : > { %s4759_s3 = sld [smem:[#allocation36_spill]] }
 0x7e9   : > { %s4760_s26 = sld [smem:[#allocation37_spill]] }
 0x7ea   : > { %s4761_s27 = sld [smem:[#allocation39_spill]] }
 0x7eb   : > { %s4762_s28 = sld [smem:[#allocation40_spill]] }
 0x7ec   :  { %2482 = vsyncpa [#allocation3], 1 }
 0x7ed   :  { %2484 = vsyncpa [#allocation3 + $0x1], 1 }
 0x7ee   :  { %2485 = vsyncpa [#allocation6], 1 }
 0x7ef   :  { %2487 = vsyncpa [#allocation6 + $0x1], 1 }
 0x7f0   :  { %2488 = vsyncpa [#allocation9], 1 }
 0x7f1   :  { %2490 = vsyncpa [#allocation9 + $0x1], 1 }
 0x7f2   :  { %2491 = vsyncpa [#allocation12], 1 }
 0x7f3   :  { %2493 = vsyncpa [#allocation12 + $0x1], 1 }
 0x7f4   :  { %2494 = vsyncpa [#allocation15], 1 }
 0x7f5   :  { %2496 = vsyncpa [#allocation15 + $0x1], 1 }
 0x7f6   :  { %2497 = vsyncpa [#allocation18], 1 }
 0x7f7   :  { %2499 = vsyncpa [#allocation18 + $0x1], 1 }
 0x7f8   :  { %2500 = vsyncpa [#allocation4], 1 }
 0x7f9   :  { %2502 = vsyncpa [#allocation4 + $0x1], 1 }

</bundles_post_ra>
